<compile_context>
chip_gen: v7x
topology: tpu7x:2x2x1
jax: 0.10.0
libtpu: 0.0.40
codegen_flags: <defaults>
</compile_context>

<pallas_src>
import functools

import jax
import jax.numpy as jnp
import numpy as np
from jax.experimental import pallas as pl
from jax.experimental.pallas import tpu as pltpu

EMBED_DIM = 100       # logical embedding dim (PyTorch spec)
EMBED_PAD = 128       # lane-aligned padded embedding dim fed to the kernel
HIDDEN = 128
NUM_LAYERS = 3


# ------------------------------ fused kernel --------------------------------
def _lstm_fused_kernel(x_ref, wih_ref, whh_ref, h0_ref, c0_ref, fcw_ref, fcb_ref,
                       logits_ref, hT_ref, cT_ref, act_ref):
    """One grid step == one LSTM layer; the last layer also runs the FC head."""
    l = pl.program_id(0)
    H = HIDDEN
    N = h0_ref.shape[1]
    S = act_ref.shape[0] // N

    # Layer 0: seed the activation scratch with the (lane-padded) embedding.
    @pl.when(l == 0)
    def _():
        act_ref[...] = x_ref[...]

    # Non-recurrent input projection hoisted out of the recurrence: a single
    # (S*N, 128) @ (128, 4H) bf16 matmul per layer, f32 accumulation.
    w_ih = wih_ref[0]                                    # (128, 4H) bf16
    w_hh = whh_ref[0]                                    # (H, 4H)  bf16
    pre = jnp.dot(act_ref[...].astype(jnp.bfloat16), w_ih,
                  preferred_element_type=jnp.float32)    # (S*N, 4H) f32

    h = h0_ref[0]                                        # (N, H) f32
    c = c0_ref[0]
    for t in range(S):                                   # fully unrolled (S tiny)
        gates = pre[t * N:(t + 1) * N, :] + jnp.dot(
            h.astype(jnp.bfloat16), w_hh, preferred_element_type=jnp.float32)
        # Gate columns were permuted host-side to [i | f | o | g]: one wide
        # tanh-form sigmoid over the contiguous (N, 3H) slab, one tanh on (N, H).
        sig = 0.5 * (jnp.tanh(0.5 * gates[:, :3 * H]) + 1.0)
        i_g = sig[:, 0 * H:1 * H]
        f_g = sig[:, 1 * H:2 * H]
        o_g = sig[:, 2 * H:3 * H]
        g_g = jnp.tanh(gates[:, 3 * H:])
        c = f_g * c + i_g * g_g
        h = o_g * jnp.tanh(c)
        act_ref[t * N:(t + 1) * N, :] = h                # lane-dense, 8-row aligned
    hT_ref[0] = h                                        # final states written once
    cT_ref[0] = c
    # TODO(synk): nn.LSTM inter-layer dropout (p=0.1) is train-mode only; eval
    # (inference) semantics are reproduced here, so it is omitted.

    # Flatten -> Linear -> Sigmoid, only after the last layer.
    @pl.when(l == pl.num_programs(0) - 1)
    def _():
        C = fcw_ref.shape[0]
        y3 = act_ref[...].reshape(S, N, H)               # leading-axis split only
        z = jnp.zeros((S, C), jnp.float32)
        for n in range(N):
            y_n = y3[:, n, :]                            # (S, H)
            w_n = fcw_ref[:, n * H:(n + 1) * H]          # (C, H)
            z = z + jax.lax.dot_general(                 # (S,H) x (C,H)^T -> (S,C)
                y_n, w_n, (((1,), (1,)), ((), ())),
                preferred_element_type=jnp.float32)
        logits_ref[...] = 0.5 * (jnp.tanh(0.5 * (z + fcb_ref[...])) + 1.0)


# ------------------------------ glue (plain JAX) -----------------------------
def embedding_lookup(ids, emb_w, max_norm):
    # nn.Embedding(max_norm=size_token): looked-up rows with ||row||_2 > max_norm
    # are rescaled (PyTorch eps=1e-7). Zero-padded columns don't change the norm.
    emb = jnp.take(emb_w, ids, axis=0)                   # (S, N, EMBED_PAD)
    norms = jnp.sqrt(jnp.sum(emb * emb, axis=-1, keepdims=True))
    scale = jnp.where(norms > max_norm, max_norm / (norms + 1e-7), 1.0)
    return emb * scale


def _permute_gates(w_t):
    """Reorder (D, 4H) columns from PyTorch [i|f|g|o] to kernel [i|f|o|g]."""
    H = HIDDEN
    return jnp.concatenate(
        [w_t[:, :2 * H], w_t[:, 3 * H:], w_t[:, 2 * H:3 * H]], axis=1)


def init_params(key, unique_words, size_token, num_classes):
    ks = jax.random.split(key, 2 + 2 * NUM_LAYERS + 2)
    kbound = 1.0 / np.sqrt(HIDDEN)
    emb = jax.random.normal(ks[0], (unique_words, EMBED_DIM), jnp.float32)
    w_ihs, w_hhs = [], []
    for l in range(NUM_LAYERS):
        D = EMBED_DIM if l == 0 else HIDDEN
        w_ih = jax.random.uniform(ks[1 + 2 * l], (D, 4 * HIDDEN), jnp.float32,
                                  -kbound, kbound)
        w_ih = _permute_gates(w_ih)
        if D < EMBED_PAD:                                # zero-pad rows 100 -> 128
            w_ih = jnp.pad(w_ih, ((0, EMBED_PAD - D), (0, 0)))
        w_hh = jax.random.uniform(ks[2 + 2 * l], (HIDDEN, 4 * HIDDEN), jnp.float32,
                                  -kbound, kbound)
        w_ihs.append(w_ih)
        w_hhs.append(_permute_gates(w_hh))
    fin = HIDDEN * size_token
    fbound = 1.0 / np.sqrt(fin)
    return {
        "max_norm": float(size_token),
        # zero-pad embedding columns 100 -> 128 (lane alignment; norm unchanged)
        "emb": jnp.pad(emb, ((0, 0), (0, EMBED_PAD - EMBED_DIM))),
        # stacked bf16 MXU operands (f32 accumulation happens in the kernel)
        "w_ih": jnp.stack(w_ihs).astype(jnp.bfloat16),   # (L, 128, 4H)
        "w_hh": jnp.stack(w_hhs).astype(jnp.bfloat16),   # (L, 128, 4H)
        # PyTorch-native (out_features, in_features) layout: lane-dense, unpadded
        "fc_w": jax.random.uniform(ks[-2], (num_classes, fin), jnp.float32,
                                   -fbound, fbound),
        "fc_b": jax.random.uniform(ks[-1], (1, num_classes), jnp.float32,
                                   -fbound, fbound),
    }


@functools.partial(jax.jit, static_argnums=(3,))
def lstm_model_forward(params, x, prev_state, num_classes):
    h0, c0 = prev_state                                  # each (L, N, H)
    emb = embedding_lookup(x, params["emb"], params["max_norm"])  # (S, N, 128)
    S, N, _ = emb.shape
    x_flat = emb.reshape(S * N, EMBED_PAD)               # time-major rows

    grid_spec = pltpu.PrefetchScalarGridSpec(
        num_scalar_prefetch=0,
        grid=(NUM_LAYERS,),                              # one grid step per layer
        in_specs=[
            pl.BlockSpec((S * N, EMBED_PAD), lambda l: (0, 0)),             # embed
            pl.BlockSpec((1, EMBED_PAD, 4 * HIDDEN), lambda l: (l, 0, 0)),  # w_ih[l]
            pl.BlockSpec((1, HIDDEN, 4 * HIDDEN), lambda l: (l, 0, 0)),     # w_hh[l]
            pl.BlockSpec((1, N, HIDDEN), lambda l: (l, 0, 0)),              # h0[l]
            pl.BlockSpec((1, N, HIDDEN), lambda l: (l, 0, 0)),              # c0[l]
            pl.BlockSpec((num_classes, N * HIDDEN), lambda l: (0, 0)),      # fc_w
            pl.BlockSpec((1, num_classes), lambda l: (0, 0)),               # fc_b
        ],
        out_specs=(
            pl.BlockSpec((S, num_classes), lambda l: (0, 0)),               # logits
            pl.BlockSpec((1, N, HIDDEN), lambda l: (l, 0, 0)),              # h_T
            pl.BlockSpec((1, N, HIDDEN), lambda l: (l, 0, 0)),              # c_T
        ),
        scratch_shapes=[pltpu.VMEM((S * N, EMBED_PAD), jnp.float32)],  # layer acts
    )
    logits, hT, cT = pl.pallas_call(
        _lstm_fused_kernel,
        out_shape=(jax.ShapeDtypeStruct((S, num_classes), jnp.float32),
                   jax.ShapeDtypeStruct((NUM_LAYERS, N, HIDDEN), jnp.float32),
                   jax.ShapeDtypeStruct((NUM_LAYERS, N, HIDDEN), jnp.float32)),
        grid_spec=grid_spec,
        compiler_params=pltpu.CompilerParams(
            dimension_semantics=("arbitrary",)),          # layers are sequential
    )(x_flat, params["w_ih"], params["w_hh"], h0, c0,
      params["fc_w"], params["fc_b"])

    if num_classes == 1:
        logits = logits.reshape(-1)
    return logits, (hT, cT)


# ------------------------------ pure-JAX reference ---------------------------
def reference_forward(params, x, prev_state, num_classes):
    """Reference with the same numerics (bf16 MXU operands, f32 gate math)."""
    h0, c0 = prev_state
    H = HIDDEN
    emb = embedding_lookup(x, params["emb"], params["max_norm"])
    S, N, _ = emb.shape
    act = emb.reshape(S * N, EMBED_PAD)
    hTs, cTs = [], []
    for l in range(NUM_LAYERS):
        pre = jnp.dot(act.astype(jnp.bfloat16), params["w_ih"][l],
                      preferred_element_type=jnp.float32)
        h, c = h0[l], c0[l]
        outs = []
        for t in range(S):
            gates = pre[t * N:(t + 1) * N] + jnp.dot(
                h.astype(jnp.bfloat16), params["w_hh"][l],
                preferred_element_type=jnp.float32)
            i_g = jax.nn.sigmoid(gates[:, 0 * H:1 * H])
            f_g = jax.nn.sigmoid(gates[:, 1 * H:2 * H])
            o_g = jax.nn.sigmoid(gates[:, 2 * H:3 * H])
            g_g = jnp.tanh(gates[:, 3 * H:])
            c = f_g * c + i_g * g_g
            h = o_g * jnp.tanh(c)
            outs.append(h)
        act = jnp.concatenate(outs, axis=0)
        hTs.append(h)
        cTs.append(c)
    y = act.reshape(S, N * H)
    logits = jax.nn.sigmoid(y @ params["fc_w"].T + params["fc_b"])
    if num_classes == 1:
        logits = logits.reshape(-1)
    return logits, (jnp.stack(hTs), jnp.stack(cTs))


if __name__ == "__main__":
    unique_words = 50
    size_token = 8          # == LSTM batch N (required by Flatten + Linear)
    num_classes = 2
    S = 4                   # sequence length fed to the LSTM (x.shape[0])

    key = jax.random.PRNGKey(0)
    k_params, k_x = jax.random.split(key)

    params = init_params(k_params, unique_words, size_token, num_classes)
    x = jax.random.randint(k_x, (S, size_token), 0, unique_words, dtype=jnp.int32)
    h0 = jnp.zeros((NUM_LAYERS, size_token, HIDDEN), jnp.float32)
    c0 = jnp.zeros((NUM_LAYERS, size_token, HIDDEN), jnp.float32)

    logits, (hT, cT) = lstm_model_forward(params, x, (h0, c0), num_classes)
    jax.block_until_ready((logits, hT, cT))

    assert logits.shape == (S, num_classes)
    assert hT.shape == (NUM_LAYERS, size_token, HIDDEN)
    assert cT.shape == (NUM_LAYERS, size_token, HIDDEN)

    ref_logits, (ref_h, ref_c) = reference_forward(params, x, (h0, c0), num_classes)
    np.testing.assert_allclose(np.asarray(logits), np.asarray(ref_logits),
                               atol=5e-3, rtol=0)
    np.testing.assert_allclose(np.asarray(hT), np.asarray(ref_h), atol=5e-3, rtol=0)
    np.testing.assert_allclose(np.asarray(cT), np.asarray(ref_c), atol=5e-3, rtol=0)
    print("KERNEL_OK")
</pallas_src>

<mosaic_0001>
module attributes {stable_mosaic.version = 11 : i64} {
  func.func @_lstm_fused_kernel(%arg0: i32, %arg1: memref<32x128xf32, #tpu.memory_space<vmem>>, %arg2: memref<1x128x512xbf16, #tpu.memory_space<vmem>>, %arg3: memref<1x128x512xbf16, #tpu.memory_space<vmem>>, %arg4: memref<1x8x128xf32, #tpu.memory_space<vmem>>, %arg5: memref<1x8x128xf32, #tpu.memory_space<vmem>>, %arg6: memref<2x1024xf32, #tpu.memory_space<vmem>>, %arg7: memref<1x2xf32, #tpu.memory_space<vmem>>, %arg8: memref<4x2xf32, #tpu.memory_space<vmem>>, %arg9: memref<1x8x128xf32, #tpu.memory_space<vmem>>, %arg10: memref<1x8x128xf32, #tpu.memory_space<vmem>>, %arg11: memref<32x128xf32, #tpu.memory_space<vmem>>) attributes {dimension_semantics = [#tpu.dimension_semantics<arbitrary>], iteration_bounds = array<i64: 3>, scalar_prefetch = 0 : i64, scratch_operands = 1 : i64, tpu.core_type = #tpu.core_type<tc>, window_params = [{pipeline_mode = #tpu.pipeline_mode<synchronous>, transform_indices = @transform_0, window_bounds = array<i64: 32, 128>}, {transform_indices = @transform_1, window_bounds = array<i64: 1, 128, 512>}, {transform_indices = @transform_2, window_bounds = array<i64: 1, 128, 512>}, {transform_indices = @transform_3, window_bounds = array<i64: 1, 8, 128>}, {transform_indices = @transform_4, window_bounds = array<i64: 1, 8, 128>}, {pipeline_mode = #tpu.pipeline_mode<synchronous>, transform_indices = @transform_5, window_bounds = array<i64: 2, 1024>}, {pipeline_mode = #tpu.pipeline_mode<synchronous>, transform_indices = @transform_6, window_bounds = array<i64: 1, 2>}, {pipeline_mode = #tpu.pipeline_mode<synchronous>, transform_indices = @transform_7, window_bounds = array<i64: 4, 2>}, {transform_indices = @transform_8, window_bounds = array<i64: 1, 8, 128>}, {transform_indices = @transform_9, window_bounds = array<i64: 1, 8, 128>}]} {
    %c0_i32 = arith.constant 0 : i32
    %0 = arith.cmpi eq, %arg0, %c0_i32 : i32
    %1 = arith.extui %0 : i1 to i32
    %c0_i32_0 = arith.constant 0 : i32
    %2 = arith.cmpi ne, %1, %c0_i32_0 : i32
    scf.if %2 {
      %c0_42 = arith.constant 0 : index
      %c0_43 = arith.constant 0 : index
      %115 = vector.load %arg1[%c0_42, %c0_43] : memref<32x128xf32, #tpu.memory_space<vmem>>, vector<32x128xf32>
      %c0_44 = arith.constant 0 : index
      %c0_45 = arith.constant 0 : index
      %116 = vector.load %arg11[%c0_44, %c0_45] : memref<32x128xf32, #tpu.memory_space<vmem>>, vector<32x128xf32>
      tpu.vector_store %arg11[%c0_44, %c0_45], %115 {strides = array<i32>} : memref<32x128xf32, #tpu.memory_space<vmem>>, vector<32x128xf32>,
    } else {
    }
    %c0 = arith.constant 0 : index
    %c0_1 = arith.constant 0 : index
    %c0_2 = arith.constant 0 : index
    %3 = vector.load %arg2[%c0, %c0_1, %c0_2] : memref<1x128x512xbf16, #tpu.memory_space<vmem>>, vector<1x128x512xbf16>
    %4 = vector.shape_cast %3 : vector<1x128x512xbf16> to vector<128x512xbf16>
    %c0_3 = arith.constant 0 : index
    %c0_4 = arith.constant 0 : index
    %c0_5 = arith.constant 0 : index
    %5 = vector.load %arg3[%c0_3, %c0_4, %c0_5] : memref<1x128x512xbf16, #tpu.memory_space<vmem>>, vector<1x128x512xbf16>
    %6 = vector.shape_cast %5 : vector<1x128x512xbf16> to vector<128x512xbf16>
    %c0_6 = arith.constant 0 : index
    %c0_7 = arith.constant 0 : index
    %7 = vector.load %arg11[%c0_6, %c0_7] : memref<32x128xf32, #tpu.memory_space<vmem>>, vector<32x128xf32>
    %8 = arith.truncf %7 : vector<32x128xf32> to vector<32x128xbf16>
    %cst = arith.constant dense<0.000000e+00> : vector<32x512xf32>
    %9 = tpu.matmul %8, %4, %cst {dimension_numbers = #tpu.dot_dimension_numbers<[1], [0], [0], [1], [0, 0, 1, 1], [], []>} : vector<32x128xbf16>, vector<128x512xbf16>, vector<32x512xf32> -> vector<32x512xf32>
    %c0_8 = arith.constant 0 : index
    %c0_9 = arith.constant 0 : index
    %c0_10 = arith.constant 0 : index
    %10 = vector.load %arg4[%c0_8, %c0_9, %c0_10] : memref<1x8x128xf32, #tpu.memory_space<vmem>>, vector<1x8x128xf32>
    %11 = vector.shape_cast %10 : vector<1x8x128xf32> to vector<8x128xf32>
    %c0_11 = arith.constant 0 : index
    %c0_12 = arith.constant 0 : index
    %c0_13 = arith.constant 0 : index
    %12 = vector.load %arg5[%c0_11, %c0_12, %c0_13] : memref<1x8x128xf32, #tpu.memory_space<vmem>>, vector<1x8x128xf32>
    %13 = vector.shape_cast %12 : vector<1x8x128xf32> to vector<8x128xf32>
    %14 = vector.extract_strided_slice %9 {offsets = [0, 0], sizes = [8, 512], strides = [1, 1]} : vector<32x512xf32> to vector<8x512xf32>
    %15 = arith.truncf %11 : vector<8x128xf32> to vector<8x128xbf16>
    %cst_14 = arith.constant dense<0.000000e+00> : vector<8x512xf32>
    %16 = tpu.matmul %15, %6, %cst_14 {dimension_numbers = #tpu.dot_dimension_numbers<[1], [0], [0], [1], [0, 0, 1, 1], [], []>} : vector<8x128xbf16>, vector<128x512xbf16>, vector<8x512xf32> -> vector<8x512xf32>
    %17 = arith.addf %14, %16 : vector<8x512xf32>
    %18 = vector.extract_strided_slice %17 {offsets = [0, 0], sizes = [8, 384], strides = [1, 1]} : vector<8x512xf32> to vector<8x384xf32>
    %cst_15 = arith.constant 5.000000e-01 : f32
    %19 = vector.broadcast %cst_15 : f32 to vector<8x384xf32>
    %20 = arith.mulf %19, %18 : vector<8x384xf32>
    %21 = math.tanh %20 : vector<8x384xf32>
    %cst_16 = arith.constant 1.000000e+00 : f32
    %22 = vector.broadcast %cst_16 : f32 to vector<8x384xf32>
    %23 = arith.addf %21, %22 : vector<8x384xf32>
    %cst_17 = arith.constant 5.000000e-01 : f32
    %24 = vector.broadcast %cst_17 : f32 to vector<8x384xf32>
    %25 = arith.mulf %24, %23 : vector<8x384xf32>
    %26 = vector.extract_strided_slice %25 {offsets = [0, 0], sizes = [8, 128], strides = [1, 1]} : vector<8x384xf32> to vector<8x128xf32>
    %27 = vector.extract_strided_slice %25 {offsets = [0, 128], sizes = [8, 128], strides = [1, 1]} : vector<8x384xf32> to vector<8x128xf32>
    %28 = vector.extract_strided_slice %25 {offsets = [0, 256], sizes = [8, 128], strides = [1, 1]} : vector<8x384xf32> to vector<8x128xf32>
    %29 = vector.extract_strided_slice %17 {offsets = [0, 384], sizes = [8, 128], strides = [1, 1]} : vector<8x512xf32> to vector<8x128xf32>
    %30 = math.tanh %29 : vector<8x128xf32>
    %31 = arith.mulf %27, %13 : vector<8x128xf32>
    %32 = arith.mulf %26, %30 : vector<8x128xf32>
    %33 = arith.addf %31, %32 : vector<8x128xf32>
    %34 = math.tanh %33 : vector<8x128xf32>
    %35 = arith.mulf %28, %34 : vector<8x128xf32>
    %c0_18 = arith.constant 0 : index
    %c0_19 = arith.constant 0 : index
    %36 = vector.load %arg11[%c0_18, %c0_19] : memref<32x128xf32, #tpu.memory_space<vmem>>, vector<8x128xf32>
    tpu.vector_store %arg11[%c0_18, %c0_19], %35 {strides = array<i32>} : memref<32x128xf32, #tpu.memory_space<vmem>>, vector<8x128xf32>,
    %37 = vector.extract_strided_slice %9 {offsets = [8, 0], sizes = [8, 512], strides = [1, 1]} : vector<32x512xf32> to vector<8x512xf32>
    %38 = arith.truncf %35 : vector<8x128xf32> to vector<8x128xbf16>
    %cst_20 = arith.constant dense<0.000000e+00> : vector<8x512xf32>
    %39 = tpu.matmul %38, %6, %cst_20 {dimension_numbers = #tpu.dot_dimension_numbers<[1], [0], [0], [1], [0, 0, 1, 1], [], []>} : vector<8x128xbf16>, vector<128x512xbf16>, vector<8x512xf32> -> vector<8x512xf32>
    %40 = arith.addf %37, %39 : vector<8x512xf32>
    %41 = vector.extract_strided_slice %40 {offsets = [0, 0], sizes = [8, 384], strides = [1, 1]} : vector<8x512xf32> to vector<8x384xf32>
    %cst_21 = arith.constant 5.000000e-01 : f32
    %42 = vector.broadcast %cst_21 : f32 to vector<8x384xf32>
    %43 = arith.mulf %42, %41 : vector<8x384xf32>
    %44 = math.tanh %43 : vector<8x384xf32>
    %cst_22 = arith.constant 1.000000e+00 : f32
    %45 = vector.broadcast %cst_22 : f32 to vector<8x384xf32>
    %46 = arith.addf %44, %45 : vector<8x384xf32>
    %cst_23 = arith.constant 5.000000e-01 : f32
    %47 = vector.broadcast %cst_23 : f32 to vector<8x384xf32>
    %48 = arith.mulf %47, %46 : vector<8x384xf32>
    %49 = vector.extract_strided_slice %48 {offsets = [0, 0], sizes = [8, 128], strides = [1, 1]} : vector<8x384xf32> to vector<8x128xf32>
    %50 = vector.extract_strided_slice %48 {offsets = [0, 128], sizes = [8, 128], strides = [1, 1]} : vector<8x384xf32> to vector<8x128xf32>
    %51 = vector.extract_strided_slice %48 {offsets = [0, 256], sizes = [8, 128], strides = [1, 1]} : vector<8x384xf32> to vector<8x128xf32>
    %52 = vector.extract_strided_slice %40 {offsets = [0, 384], sizes = [8, 128], strides = [1, 1]} : vector<8x512xf32> to vector<8x128xf32>
    %53 = math.tanh %52 : vector<8x128xf32>
    %54 = arith.mulf %50, %33 : vector<8x128xf32>
    %55 = arith.mulf %49, %53 : vector<8x128xf32>
    %56 = arith.addf %54, %55 : vector<8x128xf32>
    %57 = math.tanh %56 : vector<8x128xf32>
    %58 = arith.mulf %51, %57 : vector<8x128xf32>
    %c8 = arith.constant 8 : index
    %c0_24 = arith.constant 0 : index
    %59 = vector.load %arg11[%c8, %c0_24] : memref<32x128xf32, #tpu.memory_space<vmem>>, vector<8x128xf32>
    tpu.vector_store %arg11[%c8, %c0_24], %58 {strides = array<i32>} : memref<32x128xf32, #tpu.memory_space<vmem>>, vector<8x128xf32>,
    %60 = vector.extract_strided_slice %9 {offsets = [16, 0], sizes = [8, 512], strides = [1, 1]} : vector<32x512xf32> to vector<8x512xf32>
    %61 = arith.truncf %58 : vector<8x128xf32> to vector<8x128xbf16>
    %cst_25 = arith.constant dense<0.000000e+00> : vector<8x512xf32>
    %62 = tpu.matmul %61, %6, %cst_25 {dimension_numbers = #tpu.dot_dimension_numbers<[1], [0], [0], [1], [0, 0, 1, 1], [], []>} : vector<8x128xbf16>, vector<128x512xbf16>, vector<8x512xf32> -> vector<8x512xf32>
    %63 = arith.addf %60, %62 : vector<8x512xf32>
    %64 = vector.extract_strided_slice %63 {offsets = [0, 0], sizes = [8, 384], strides = [1, 1]} : vector<8x512xf32> to vector<8x384xf32>
    %cst_26 = arith.constant 5.000000e-01 : f32
    %65 = vector.broadcast %cst_26 : f32 to vector<8x384xf32>
    %66 = arith.mulf %65, %64 : vector<8x384xf32>
    %67 = math.tanh %66 : vector<8x384xf32>
    %cst_27 = arith.constant 1.000000e+00 : f32
    %68 = vector.broadcast %cst_27 : f32 to vector<8x384xf32>
    %69 = arith.addf %67, %68 : vector<8x384xf32>
    %cst_28 = arith.constant 5.000000e-01 : f32
    %70 = vector.broadcast %cst_28 : f32 to vector<8x384xf32>
    %71 = arith.mulf %70, %69 : vector<8x384xf32>
    %72 = vector.extract_strided_slice %71 {offsets = [0, 0], sizes = [8, 128], strides = [1, 1]} : vector<8x384xf32> to vector<8x128xf32>
    %73 = vector.extract_strided_slice %71 {offsets = [0, 128], sizes = [8, 128], strides = [1, 1]} : vector<8x384xf32> to vector<8x128xf32>
    %74 = vector.extract_strided_slice %71 {offsets = [0, 256], sizes = [8, 128], strides = [1, 1]} : vector<8x384xf32> to vector<8x128xf32>
    %75 = vector.extract_strided_slice %63 {offsets = [0, 384], sizes = [8, 128], strides = [1, 1]} : vector<8x512xf32> to vector<8x128xf32>
    %76 = math.tanh %75 : vector<8x128xf32>
    %77 = arith.mulf %73, %56 : vector<8x128xf32>
    %78 = arith.mulf %72, %76 : vector<8x128xf32>
    %79 = arith.addf %77, %78 : vector<8x128xf32>
    %80 = math.tanh %79 : vector<8x128xf32>
    %81 = arith.mulf %74, %80 : vector<8x128xf32>
    %c16 = arith.constant 16 : index
    %c0_29 = arith.constant 0 : index
    %82 = vector.load %arg11[%c16, %c0_29] : memref<32x128xf32, #tpu.memory_space<vmem>>, vector<8x128xf32>
    tpu.vector_store %arg11[%c16, %c0_29], %81 {strides = array<i32>} : memref<32x128xf32, #tpu.memory_space<vmem>>, vector<8x128xf32>,
    %83 = vector.extract_strided_slice %9 {offsets = [24, 0], sizes = [8, 512], strides = [1, 1]} : vector<32x512xf32> to vector<8x512xf32>
    %84 = arith.truncf %81 : vector<8x128xf32> to vector<8x128xbf16>
    %cst_30 = arith.constant dense<0.000000e+00> : vector<8x512xf32>
    %85 = tpu.matmul %84, %6, %cst_30 {dimension_numbers = #tpu.dot_dimension_numbers<[1], [0], [0], [1], [0, 0, 1, 1], [], []>} : vector<8x128xbf16>, vector<128x512xbf16>, vector<8x512xf32> -> vector<8x512xf32>
    %86 = arith.addf %83, %85 : vector<8x512xf32>
    %87 = vector.extract_strided_slice %86 {offsets = [0, 0], sizes = [8, 384], strides = [1, 1]} : vector<8x512xf32> to vector<8x384xf32>
    %cst_31 = arith.constant 5.000000e-01 : f32
    %88 = vector.broadcast %cst_31 : f32 to vector<8x384xf32>
    %89 = arith.mulf %88, %87 : vector<8x384xf32>
    %90 = math.tanh %89 : vector<8x384xf32>
    %cst_32 = arith.constant 1.000000e+00 : f32
    %91 = vector.broadcast %cst_32 : f32 to vector<8x384xf32>
    %92 = arith.addf %90, %91 : vector<8x384xf32>
    %cst_33 = arith.constant 5.000000e-01 : f32
    %93 = vector.broadcast %cst_33 : f32 to vector<8x384xf32>
    %94 = arith.mulf %93, %92 : vector<8x384xf32>
    %95 = vector.extract_strided_slice %94 {offsets = [0, 0], sizes = [8, 128], strides = [1, 1]} : vector<8x384xf32> to vector<8x128xf32>
    %96 = vector.extract_strided_slice %94 {offsets = [0, 128], sizes = [8, 128], strides = [1, 1]} : vector<8x384xf32> to vector<8x128xf32>
    %97 = vector.extract_strided_slice %94 {offsets = [0, 256], sizes = [8, 128], strides = [1, 1]} : vector<8x384xf32> to vector<8x128xf32>
    %98 = vector.extract_strided_slice %86 {offsets = [0, 384], sizes = [8, 128], strides = [1, 1]} : vector<8x512xf32> to vector<8x128xf32>
    %99 = math.tanh %98 : vector<8x128xf32>
    %100 = arith.mulf %96, %79 : vector<8x128xf32>
    %101 = arith.mulf %95, %99 : vector<8x128xf32>
    %102 = arith.addf %100, %101 : vector<8x128xf32>
    %103 = math.tanh %102 : vector<8x128xf32>
    %104 = arith.mulf %97, %103 : vector<8x128xf32>
    %c24 = arith.constant 24 : index
    %c0_34 = arith.constant 0 : index
    %105 = vector.load %arg11[%c24, %c0_34] : memref<32x128xf32, #tpu.memory_space<vmem>>, vector<8x128xf32>
    tpu.vector_store %arg11[%c24, %c0_34], %104 {strides = array<i32>} : memref<32x128xf32, #tpu.memory_space<vmem>>, vector<8x128xf32>,
    %c0_35 = arith.constant 0 : index
    %c0_36 = arith.constant 0 : index
    %c0_37 = arith.constant 0 : index
    %106 = vector.load %arg9[%c0_35, %c0_36, %c0_37] : memref<1x8x128xf32, #tpu.memory_space<vmem>>, vector<1x8x128xf32>
    %107 = vector.shape_cast %106 : vector<1x8x128xf32> to vector<8x128xf32>
    %108 = vector.shape_cast %104 : vector<8x128xf32> to vector<1x8x128xf32>
    tpu.vector_store %arg9[%c0_35, %c0_36, %c0_37], %108 {strides = array<i32>} : memref<1x8x128xf32, #tpu.memory_space<vmem>>, vector<1x8x128xf32>,
    %c0_38 = arith.constant 0 : index
    %c0_39 = arith.constant 0 : index
    %c0_40 = arith.constant 0 : index
    %109 = vector.load %arg10[%c0_38, %c0_39, %c0_40] : memref<1x8x128xf32, #tpu.memory_space<vmem>>, vector<1x8x128xf32>
    %110 = vector.shape_cast %109 : vector<1x8x128xf32> to vector<8x128xf32>
    %111 = vector.shape_cast %102 : vector<8x128xf32> to vector<1x8x128xf32>
    tpu.vector_store %arg10[%c0_38, %c0_39, %c0_40], %111 {strides = array<i32>} : memref<1x8x128xf32, #tpu.memory_space<vmem>>, vector<1x8x128xf32>,
    %c2_i32 = arith.constant 2 : i32
    %112 = arith.cmpi eq, %arg0, %c2_i32 : i32
    %113 = arith.extui %112 : i1 to i32
    %c0_i32_41 = arith.constant 0 : i32
    %114 = arith.cmpi ne, %113, %c0_i32_41 : i32
    scf.if %114 {
      %c0_42 = arith.constant 0 : index
      %c0_43 = arith.constant 0 : index
      %115 = vector.load %arg11[%c0_42, %c0_43] : memref<32x128xf32, #tpu.memory_space<vmem>>, vector<32x128xf32>
      %116 = vector.shape_cast %115 : vector<32x128xf32> to vector<4x8x128xf32>
      %cst_44 = arith.constant 0.000000e+00 : f32
      %117 = vector.broadcast %cst_44 : f32 to vector<4x2xf32>
      %118 = vector.extract_strided_slice %116 {offsets = [0, 0, 0], sizes = [4, 1, 128], strides = [1, 1, 1]} : vector<4x8x128xf32> to vector<4x1x128xf32>
      %119 = vector.shape_cast %118 : vector<4x1x128xf32> to vector<4x128xf32>
      %c0_45 = arith.constant 0 : index
      %c0_46 = arith.constant 0 : index
      %120 = vector.load %arg6[%c0_45, %c0_46] : memref<2x1024xf32, #tpu.memory_space<vmem>>, vector<2x128xf32>
      %cst_47 = arith.constant dense<0.000000e+00> : vector<4x2xf32>
      %121 = tpu.matmul %119, %120, %cst_47 {dimension_numbers = #tpu.dot_dimension_numbers<[1], [1], [0], [0], [0, 0, 1, 0], [], []>} : vector<4x128xf32>, vector<2x128xf32>, vector<4x2xf32> -> vector<4x2xf32>
      %122 = arith.addf %117, %121 : vector<4x2xf32>
      %123 = vector.extract_strided_slice %116 {offsets = [0, 1, 0], sizes = [4, 1, 128], strides = [1, 1, 1]} : vector<4x8x128xf32> to vector<4x1x128xf32>
      %124 = vector.shape_cast %123 : vector<4x1x128xf32> to vector<4x128xf32>
      %c0_48 = arith.constant 0 : index
      %c128 = arith.constant 128 : index
      %125 = vector.load %arg6[%c0_48, %c128] : memref<2x1024xf32, #tpu.memory_space<vmem>>, vector<2x128xf32>
      %cst_49 = arith.constant dense<0.000000e+00> : vector<4x2xf32>
      %126 = tpu.matmul %124, %125, %cst_49 {dimension_numbers = #tpu.dot_dimension_numbers<[1], [1], [0], [0], [0, 0, 1, 0], [], []>} : vector<4x128xf32>, vector<2x128xf32>, vector<4x2xf32> -> vector<4x2xf32>
      %127 = arith.addf %122, %126 : vector<4x2xf32>
      %128 = vector.extract_strided_slice %116 {offsets = [0, 2, 0], sizes = [4, 1, 128], strides = [1, 1, 1]} : vector<4x8x128xf32> to vector<4x1x128xf32>
      %129 = vector.shape_cast %128 : vector<4x1x128xf32> to vector<4x128xf32>
      %c0_50 = arith.constant 0 : index
      %c256 = arith.constant 256 : index
      %130 = vector.load %arg6[%c0_50, %c256] : memref<2x1024xf32, #tpu.memory_space<vmem>>, vector<2x128xf32>
      %cst_51 = arith.constant dense<0.000000e+00> : vector<4x2xf32>
      %131 = tpu.matmul %129, %130, %cst_51 {dimension_numbers = #tpu.dot_dimension_numbers<[1], [1], [0], [0], [0, 0, 1, 0], [], []>} : vector<4x128xf32>, vector<2x128xf32>, vector<4x2xf32> -> vector<4x2xf32>
      %132 = arith.addf %127, %131 : vector<4x2xf32>
      %133 = vector.extract_strided_slice %116 {offsets = [0, 3, 0], sizes = [4, 1, 128], strides = [1, 1, 1]} : vector<4x8x128xf32> to vector<4x1x128xf32>
      %134 = vector.shape_cast %133 : vector<4x1x128xf32> to vector<4x128xf32>
      %c0_52 = arith.constant 0 : index
      %c384 = arith.constant 384 : index
      %135 = vector.load %arg6[%c0_52, %c384] : memref<2x1024xf32, #tpu.memory_space<vmem>>, vector<2x128xf32>
      %cst_53 = arith.constant dense<0.000000e+00> : vector<4x2xf32>
      %136 = tpu.matmul %134, %135, %cst_53 {dimension_numbers = #tpu.dot_dimension_numbers<[1], [1], [0], [0], [0, 0, 1, 0], [], []>} : vector<4x128xf32>, vector<2x128xf32>, vector<4x2xf32> -> vector<4x2xf32>
      %137 = arith.addf %132, %136 : vector<4x2xf32>
      %138 = vector.extract_strided_slice %116 {offsets = [0, 4, 0], sizes = [4, 1, 128], strides = [1, 1, 1]} : vector<4x8x128xf32> to vector<4x1x128xf32>
      %139 = vector.shape_cast %138 : vector<4x1x128xf32> to vector<4x128xf32>
      %c0_54 = arith.constant 0 : index
      %c512 = arith.constant 512 : index
      %140 = vector.load %arg6[%c0_54, %c512] : memref<2x1024xf32, #tpu.memory_space<vmem>>, vector<2x128xf32>
      %cst_55 = arith.constant dense<0.000000e+00> : vector<4x2xf32>
      %141 = tpu.matmul %139, %140, %cst_55 {dimension_numbers = #tpu.dot_dimension_numbers<[1], [1], [0], [0], [0, 0, 1, 0], [], []>} : vector<4x128xf32>, vector<2x128xf32>, vector<4x2xf32> -> vector<4x2xf32>
      %142 = arith.addf %137, %141 : vector<4x2xf32>
      %143 = vector.extract_strided_slice %116 {offsets = [0, 5, 0], sizes = [4, 1, 128], strides = [1, 1, 1]} : vector<4x8x128xf32> to vector<4x1x128xf32>
      %144 = vector.shape_cast %143 : vector<4x1x128xf32> to vector<4x128xf32>
      %c0_56 = arith.constant 0 : index
      %c640 = arith.constant 640 : index
      %145 = vector.load %arg6[%c0_56, %c640] : memref<2x1024xf32, #tpu.memory_space<vmem>>, vector<2x128xf32>
      %cst_57 = arith.constant dense<0.000000e+00> : vector<4x2xf32>
      %146 = tpu.matmul %144, %145, %cst_57 {dimension_numbers = #tpu.dot_dimension_numbers<[1], [1], [0], [0], [0, 0, 1, 0], [], []>} : vector<4x128xf32>, vector<2x128xf32>, vector<4x2xf32> -> vector<4x2xf32>
      %147 = arith.addf %142, %146 : vector<4x2xf32>
      %148 = vector.extract_strided_slice %116 {offsets = [0, 6, 0], sizes = [4, 1, 128], strides = [1, 1, 1]} : vector<4x8x128xf32> to vector<4x1x128xf32>
      %149 = vector.shape_cast %148 : vector<4x1x128xf32> to vector<4x128xf32>
      %c0_58 = arith.constant 0 : index
      %c768 = arith.constant 768 : index
      %150 = vector.load %arg6[%c0_58, %c768] : memref<2x1024xf32, #tpu.memory_space<vmem>>, vector<2x128xf32>
      %cst_59 = arith.constant dense<0.000000e+00> : vector<4x2xf32>
      %151 = tpu.matmul %149, %150, %cst_59 {dimension_numbers = #tpu.dot_dimension_numbers<[1], [1], [0], [0], [0, 0, 1, 0], [], []>} : vector<4x128xf32>, vector<2x128xf32>, vector<4x2xf32> -> vector<4x2xf32>
      %152 = arith.addf %147, %151 : vector<4x2xf32>
      %153 = vector.extract_strided_slice %116 {offsets = [0, 7, 0], sizes = [4, 1, 128], strides = [1, 1, 1]} : vector<4x8x128xf32> to vector<4x1x128xf32>
      %154 = vector.shape_cast %153 : vector<4x1x128xf32> to vector<4x128xf32>
      %c0_60 = arith.constant 0 : index
      %c896 = arith.constant 896 : index
      %155 = vector.load %arg6[%c0_60, %c896] : memref<2x1024xf32, #tpu.memory_space<vmem>>, vector<2x128xf32>
      %cst_61 = arith.constant dense<0.000000e+00> : vector<4x2xf32>
      %156 = tpu.matmul %154, %155, %cst_61 {dimension_numbers = #tpu.dot_dimension_numbers<[1], [1], [0], [0], [0, 0, 1, 0], [], []>} : vector<4x128xf32>, vector<2x128xf32>, vector<4x2xf32> -> vector<4x2xf32>
      %157 = arith.addf %152, %156 : vector<4x2xf32>
      %c0_62 = arith.constant 0 : index
      %c0_63 = arith.constant 0 : index
      %158 = vector.load %arg7[%c0_62, %c0_63] : memref<1x2xf32, #tpu.memory_space<vmem>>, vector<1x2xf32>
      %159 = vector.broadcast %158 : vector<1x2xf32> to vector<4x2xf32>
      %160 = arith.addf %157, %159 : vector<4x2xf32>
      %cst_64 = arith.constant 5.000000e-01 : f32
      %161 = vector.broadcast %cst_64 : f32 to vector<4x2xf32>
      %162 = arith.mulf %161, %160 : vector<4x2xf32>
      %163 = math.tanh %162 : vector<4x2xf32>
      %cst_65 = arith.constant 1.000000e+00 : f32
      %164 = vector.broadcast %cst_65 : f32 to vector<4x2xf32>
      %165 = arith.addf %163, %164 : vector<4x2xf32>
      %cst_66 = arith.constant 5.000000e-01 : f32
      %166 = vector.broadcast %cst_66 : f32 to vector<4x2xf32>
      %167 = arith.mulf %166, %165 : vector<4x2xf32>
      %c0_67 = arith.constant 0 : index
      %c0_68 = arith.constant 0 : index
      %168 = vector.load %arg8[%c0_67, %c0_68] : memref<4x2xf32, #tpu.memory_space<vmem>>, vector<4x2xf32>
      tpu.vector_store %arg8[%c0_67, %c0_68], %167 {strides = array<i32>} : memref<4x2xf32, #tpu.memory_space<vmem>>, vector<4x2xf32>,
    } else {
    }
    return
  }
  func.func @transform_0(%arg0: i32) -> (i32, i32) {
    %c0_i32 = arith.constant 0 : i32
    %c0_i32_0 = arith.constant 0 : i32
    %c0_i32_1 = arith.constant 0 : i32
    return %c0_i32, %c0_i32_0 : i32, i32
  }
  func.func @transform_1(%arg0: i32) -> (i32, i32, i32) {
    %c0_i32 = arith.constant 0 : i32
    %c0_i32_0 = arith.constant 0 : i32
    %c0_i32_1 = arith.constant 0 : i32
    return %arg0, %c0_i32, %c0_i32_0 : i32, i32, i32
  }
  func.func @transform_2(%arg0: i32) -> (i32, i32, i32) {
    %c0_i32 = arith.constant 0 : i32
    %c0_i32_0 = arith.constant 0 : i32
    %c0_i32_1 = arith.constant 0 : i32
    return %arg0, %c0_i32, %c0_i32_0 : i32, i32, i32
  }
  func.func @transform_3(%arg0: i32) -> (i32, i32, i32) {
    %c0_i32 = arith.constant 0 : i32
    %c0_i32_0 = arith.constant 0 : i32
    %c0_i32_1 = arith.constant 0 : i32
    return %arg0, %c0_i32, %c0_i32_0 : i32, i32, i32
  }
  func.func @transform_4(%arg0: i32) -> (i32, i32, i32) {
    %c0_i32 = arith.constant 0 : i32
    %c0_i32_0 = arith.constant 0 : i32
    %c0_i32_1 = arith.constant 0 : i32
    return %arg0, %c0_i32, %c0_i32_0 : i32, i32, i32
  }
  func.func @transform_5(%arg0: i32) -> (i32, i32) {
    %c0_i32 = arith.constant 0 : i32
    %c0_i32_0 = arith.constant 0 : i32
    %c0_i32_1 = arith.constant 0 : i32
    return %c0_i32, %c0_i32_0 : i32, i32
  }
  func.func @transform_6(%arg0: i32) -> (i32, i32) {
    %c0_i32 = arith.constant 0 : i32
    %c0_i32_0 = arith.constant 0 : i32
    %c0_i32_1 = arith.constant 0 : i32
    return %c0_i32, %c0_i32_0 : i32, i32
  }
  func.func @transform_7(%arg0: i32) -> (i32, i32) {
    %c0_i32 = arith.constant 0 : i32
    %c0_i32_0 = arith.constant 0 : i32
    %c0_i32_1 = arith.constant 0 : i32
    return %c0_i32, %c0_i32_0 : i32, i32
  }
  func.func @transform_8(%arg0: i32) -> (i32, i32, i32) {
    %c0_i32 = arith.constant 0 : i32
    %c0_i32_0 = arith.constant 0 : i32
    %c0_i32_1 = arith.constant 0 : i32
    return %arg0, %c0_i32, %c0_i32_0 : i32, i32, i32
  }
  func.func @transform_9(%arg0: i32) -> (i32, i32, i32) {
    %c0_i32 = arith.constant 0 : i32
    %c0_i32_0 = arith.constant 0 : i32
    %c0_i32_1 = arith.constant 0 : i32
    return %arg0, %c0_i32, %c0_i32_0 : i32, i32, i32
  }
}

</mosaic_0001>

<bundles_post_ra>
// kernel: lstm_model_forward.1
= control target key start
LH: loop header
LB: loop body
LE: loop exit
PB: predicated region body
PF: predicated region fallthrough
CT: control target
= control target key end

     0   :  { %s3500_s0 = inlined_call_operand.vmem [shape: f32[32,128], index: 0, kind: input, shape index: {}]   ;;  %s3501_s1 = inlined_call_operand.hbm [shape: bf16[3,128,512], index: 1, kind: input, shape index: {}]   ;;  %s3502_s2 = inlined_call_operand.hbm [shape: bf16[3,128,512], index: 2, kind: input, shape index: {}]   ;;  %s3503_s3 = inlined_call_operand.vmem [shape: f32[3,8,128], index: 3, kind: input, shape index: {}]   ;;  %s3504_s4 = inlined_call_operand.vmem [shape: f32[3,8,128], index: 4, kind: input, shape index: {}]   ;;  %s3505_s5 = inlined_call_operand.vmem [shape: f32[2,1024], index: 5, kind: input, shape index: {}]   ;;  %s3506_s6 = inlined_call_operand.vmem [shape: f32[1,2], index: 6, kind: input, shape index: {}]   ;;  %s3507_s7 = inlined_call_operand.vmem [shape: f32[4,2], index: 7, kind: output, shape index: {0}]   ;;  %s3508_s8 = inlined_call_operand.hbm [shape: f32[3,8,128], index: 8, kind: output, shape index: {1}]   ;;  %s3509_s9 = inlined_call_operand.hbm [shape: f32[3,8,128], index: 9, kind: output, shape index: {2}]  }
   0x1   :  { %3520 = sst [smem:[#allocation20_spill]] %s3501_s1 }
   0x2   :  { %3521 = sst [smem:[#allocation21_spill]] %s3502_s2 }
   0x3   :  { %15 = vsyncpa [#allocation4], 0 }
   0x4   :  { %17 = vsyncpa [#allocation4 + $0x1], 0 }
   0x5   :  { %18 = vsyncpa [#allocation7], 0 }
   0x6   :  { %20 = vsyncpa [#allocation7 + $0x1], 0 }
   0x7   :  { %21 = vsyncpa [#allocation5], 0 }
   0x8   :  { %23 = vsyncpa [#allocation5 + $0x1], 0 }
   0x9   :  { %24 = vsyncpa [#allocation10], 0 }
   0xa   :  { %26 = vsyncpa [#allocation10 + $0x1], 0  ;;  %s2789_s30 = smov 0   ;;  %s2791_s10 = smov 0  }
   0xb   :  { %s2793_s11 = smov 0   ;;  %s2795_s12 = smov 0  }
   0xc LB: > { %3522 = sst [smem:[#allocation15_spill]] %s2724_s11  ;;  %s2810_s13 = sadd.s32 4294967295, %s2728_s12   ;;  %s2728_s12 = sphi %s2795_s12, %s3545_s12   ;;  %s2724_s11 = sphi %s2793_s11, %s3547_s11   ;;  %s2720_s10 = sphi %s2791_s10, %s3549_s10   ;;  %s2716_s30 = sphi %s2789_s30, %s3548_s30  }
   0xd   : > { %s2220_s14 = sadd.s32 4294967294, %s2728_s12   ;;  %s2814_s15 = sadd.s32 1, %s2728_s12  }
   0xe   : > { %3523 = sst [smem:[#allocation16_spill]] %s2814_s15  ;;  %s60_s16 = sadd.s32 1, %s2724_s11 }
   0xf   : > { %s57_s17 = ssub.s32 %s2728_s12, %s2814_s15  ;;  %p67_p0 = scmp.ne.s32.totalorder %s2724_s11, %s2720_s10 }
  0x10   : > { %p58_p1 = scmp.eq.s32.totalorder %s57_s17, 0  ;;  %p68_p2 = scmp.eq.s32.totalorder %s2728_s12, 0 }
  0x11   : > { %p73_p3 = scmp.ne.s32.totalorder %s2720_s10, %s2716_s30  ;;  %p74_p4 = scmp.eq.s32.totalorder %s2810_s13, 0 }
  0x12   : > { %s2826_s18 = scalar_select %p58_p1, %s2724_s11, %s60_s16  }
  0x13   : > { %p2828_p5 = por %p68_p2, %p67_p0  ;;  %p2832_p6 = por %p74_p4, %p73_p3 }
  0x14   : > { %3524 = sst [smem:[#allocation17_spill]] %s2826_s18  ;;  %p238_p7 = scmp.eq.s32.totalorder %s2810_s13, 2 }
  0x15   : > { %s3526_s20 = scalar_select %p2832_p6, 1, 0 }
  0x16   : > { %p244_p8 = scmp.eq.s32.totalorder %s2220_s14, 2  ;;  %p2389_p9 = scmp.lt.s32.totalorder %s2728_s12, 3 }
  0x17   : > { %p2838_p10 = por %p238_p7, %p67_p0  ;;  %s2847_s23 = sand.u32 1, %s2724_s11  }
  0x18   : > { %p2842_p11 = por %p244_p8, %p73_p3  ;;  %s3511_s24 = sshll.u32 %s2728_s12, 12 }
  0x19   : > { %s3527_s21 = scalar_select %p2838_p10, 1, 0 }
  0x1a   : > { %s3528_s22 = scalar_select %p2842_p11, 1, 0 }
  0x1b   : > { %s3510_s25 = sshll.u32 %s2847_s23, 8  ;;  %s3529_s1 = sld [smem:[#allocation20_spill]] }
  0x1c   : > { %s303_s29 = scalar_lea.vmem [#allocation3], %s3510_s25  ;;  %p2862_p12 = pnand %p2389_p9, %p2828_p5 }
  0x1d   : > { %s310_s14 = sshll.u32 %s303_s29, 4  ;;  %s2866_s14 = int_to_ptr.vmem [resolvable:$true] %s310_s14 }
  0x1e   : > { %p2568_p0 = pneg %p2862_p12 }
  0x21   : > { %s2856_s28 = scalar_lea.hbm %s3529_s1, %s3511_s24  ;;  %s2571_s19 = scalar_lea.hbm %s3529_s1, 12288 }
  0x22   : > { %s2566_s26 = scalar_lea.hbm %s2856_s28, 4096  ;;  %p2572_p3 = scmp.lt.u32.totalorder %s2856_s28, %s3529_s1 }
  0x23   : > { %p2567_p13 = scmp.ne.s32.totalorder %s2856_s28, %s2566_s26  ;;  %p2573_p4 = scmp.lt.u32.totalorder %s2571_s19, %s2566_s26 }
  0x24   : > { %p2575_p7 = scmp.lt.u32.totalorder %s2566_s26, %s2856_s28 }
  0x25   : > { %p2569_p1 = pnand %p2568_p0, %p2567_p13  ;;  %p2574_p5 = por %p2573_p4, %p2572_p3 }
  0x27   : > { %p2570_p2 = pneg %p2569_p1  ;;  %p2576_p8 = por %p2575_p7, %p2574_p5 }
  0x29   : > { %p2577_p9 = pnand %p2576_p8, %p2570_p2 }
  0x2b   : > { %2580 = shalt.err (!%p2577_p9)
}
  0x2c   : > { %s2581_s17 = scalar_lea.vmem %s2866_s14, 4096  ;;  %s2730_s27 = smov [#allocation3]  }
  0x2d   : > { %p2582_p13 = scmp.ne.s32.totalorder %s2866_s14, %s2581_s17  ;;  %s2586_s29 = sshll.u32 %s2730_s27, 4  ;;  %s2587_s29 = int_to_ptr.vmem [resolvable:$false] %s2586_s29 }
  0x2e   : > { %s2588_s24 = scalar_lea.vmem %s2587_s29, 8192  ;;  %p2589_p10 = scmp.lt.s32.totalorder %s2866_s14, %s2587_s29 }
  0x2f   : > { %p2584_p1 = pnand %p2582_p13, %p2568_p0  ;;  %p2590_p3 = scmp.lt.s32.totalorder %s2588_s24, %s2581_s17 }
  0x31   : > { %p2585_p11 = pneg %p2584_p1  ;;  %p2591_p4 = por %p2590_p3, %p2589_p10 }
  0x33   : > { %p2592_p5 = pnand %p2591_p4, %p2585_p11 }
  0x35   : > { %2595 = shalt.err (!%p2592_p5)
}
  0x36   : > { %s3516_s25 = smov 256   ;;  %s2732_s26 = smov 16  }
  0x37   : > { %s3531_s17 = scalar_lea.sflag [#allocation4], %s2847_s23  ;;  %p2229_p10 = scmp.ge.s32.totalorder %s2728_s12, 1 }
  0x38   : > { %2378 = dma.hbm_to_vmem [thread:$0]  (!%p2862_p12), %s2856_s28, 4096, %s2866_s14, %s3531_s17, %s3516_s25, %s3516_s25, %s2732_s26  }
  0x39   : > { %p353_p11 = scmp.lt.s32.totalorder %s2728_s12, 4  ;;  %s3533_s27 = sshll.u32 %s2728_s12, 12 }
  0x3a   : > { %s3534_s2 = sld [smem:[#allocation21_spill]]  ;;  %s3535_s18 = sshll.u32 %s2847_s23, 8 }
  0x3b   : > { %p2901_p2 = pnand %p2229_p10, %p353_p11  ;;  %s324_s11 = scalar_lea.vmem [#allocation6], %s3535_s18 }
  0x3c   : > { %s331_s15 = sshll.u32 %s324_s11, 4  ;;  %s321_s28 = scalar_lea.sflag [#allocation7], %s2847_s23  ;;  %s2914_s15 = int_to_ptr.vmem [resolvable:$true] %s331_s15 }
  0x40   : > { %s2910_s1 = scalar_lea.hbm %s3534_s2, %s3533_s27  ;;  %s2601_s27 = scalar_lea.hbm %s3534_s2, 12288 }
  0x41   : > { %s2596_s14 = scalar_lea.hbm %s2910_s1, 4096  ;;  %p2602_p13 = scmp.lt.u32.totalorder %s2910_s1, %s3534_s2 }
  0x42   : > { %p2597_p7 = scmp.ne.s32.totalorder %s2910_s1, %s2596_s14  ;;  %p2603_p1 = scmp.lt.u32.totalorder %s2601_s27, %s2596_s14 }
  0x43   : > { %p2605_p4 = scmp.lt.u32.totalorder %s2596_s14, %s2910_s1 }
  0x44   : > { %p2599_p8 = pnand %p2597_p7, %p2568_p0  ;;  %p2604_p3 = por %p2603_p1, %p2602_p13 }
  0x46   : > { %p2600_p9 = pneg %p2599_p8  ;;  %p2606_p5 = por %p2605_p4, %p2604_p3 }
  0x48   : > { %p2607_p10 = pnand %p2606_p5, %p2600_p9 }
  0x4a   : > { %2610 = shalt.err (!%p2607_p10)
}
  0x4b   : > { %s2611_s11 = scalar_lea.vmem %s2914_s15, 4096  ;;  %s2733_s18 = smov [#allocation6]  }
  0x4c   : > { %p2612_p11 = scmp.ne.s32.totalorder %s2914_s15, %s2611_s11  ;;  %s2616_s17 = sshll.u32 %s2733_s18, 4  ;;  %s2617_s17 = int_to_ptr.vmem [resolvable:$false] %s2616_s17 }
  0x4d   : > { %s2618_s25 = scalar_lea.vmem %s2617_s17, 8192  ;;  %p2619_p6 = scmp.lt.s32.totalorder %s2914_s15, %s2617_s17 }
  0x4e   : > { %p2614_p7 = pnand %p2612_p11, %p2568_p0  ;;  %p2620_p13 = scmp.lt.s32.totalorder %s2618_s25, %s2611_s11 }
  0x50   : > { %p2615_p8 = pneg %p2614_p7  ;;  %p2621_p1 = por %p2620_p13, %p2619_p6 }
  0x52   : > { %p2622_p3 = pnand %p2621_p1, %p2615_p8 }
  0x54   : > { %2625 = shalt.err (!%p2622_p3)
}
  0x55   : > { %s3536_s14 = smov 256   ;;  %357 = sbr.rel (%p2901_p2) target bundleno = 1487 (0x5cf), region = 48 }
  0x56   : > { %2381 = dma.hbm_to_vmem [thread:$0]  (!%p2862_p12), %s2910_s1, 4096, %s2914_s15, %s321_s28, %s3536_s14, %s3536_s14, %s2732_s26  }
  0x5c   : > { %s2948_s29 = sand.u32 1, %s2720_s10   ;;  %p3537_p6 = scmp.ne.s32.totalorder %s3526_s20, 0 }
  0x5d   : > { %s2230_s27 = sshll.u32 %s2948_s29, 8  ;;  %s360_s24 = scalar_lea.sflag [#allocation4], %s2948_s29 }
  0x5e   : > { %s2952_s16 = scalar_lea.vmem [#allocation3], %s2230_s27 }
  0x5f   : > { %2699 = dma.done.wait (%p3537_p6), %s360_s24, 4096  }
  0x60   : > { %2701 = vsyncadd (%p3537_p6), %s360_s24, 4294963200  ;;  %s369_s1 = scalar_lea.sflag [#allocation7], %s2948_s29  ;;  %s2959_s15 = scalar_lea.vmem [#allocation6], %s2230_s27 }
  0x61   : > { %2703 = dma.done.wait (%p3537_p6), %s369_s1, 4096  }
  0x62   : > { %2705 = vsyncadd (%p3537_p6), %s369_s1, 4294963200  ;;  %s2232_s23 = sshll.u32 %s2948_s29, 3  ;;  %p425_p12 = scmp.lt.s32.totalorder %s2810_s13, 2 }
  0x63   : > { %s2978_s27 = scalar_lea.vmem [#allocation8], %s2232_s23  ;;  %s2980_s20 = scalar_lea.vmem [#allocation9], %s2232_s23 }
  0x64   : > { %s426_s26 = scalar_select %p425_p12, %s2810_s13, 2 }
  0x65   : > { %p2236_p0 = scmp.ne.s32.totalorder %s2810_s13, 0 }
  0x66   : > { %s2234_s19 = sshll.u32 %s426_s26, 3  ;;  %v438_v0 = vld [vmem:[%s3500_s0] sm:$0xff] (!%p2236_p0)  ;;  %v439_v1 = vld [vmem:[%s3500_s0 + $0x8] sm:$0xff] (!%p2236_p0)  ;;  %v440_v2 = vld [vmem:[%s3500_s0 + $0x10] sm:$0xff] (!%p2236_p0) }
  0x67   : > { %s2971_s18 = scalar_lea.vmem %s3503_s3, %s2234_s19  ;;  %s2976_s14 = scalar_lea.vmem %s3504_s4, %s2234_s19  ;;  %442 = vst [vmem:[#allocation2] sm:$0xff] (!%p2236_p0), %v438_v0  ;;  %443 = vst [vmem:[#allocation2 + $0x8] sm:$0xff] (!%p2236_p0), %v439_v1  ;;  %v441_v3 = vld [vmem:[%s3500_s0 + $0x18] sm:$0xff] (!%p2236_p0) }
  0x68   : > { %437 = sbr.rel (%p2236_p0) target bundleno = 111 (0x6f), region = 60  ;;  %444 = vst [vmem:[#allocation2 + $0x10] sm:$0xff] (!%p2236_p0), %v440_v2  ;;  %445 = vst [vmem:[#allocation2 + $0x18] sm:$0xff] (!%p2236_p0), %v441_v3 }
  0x6f PF: > { %v2428_v4 = vld [vmem:[%s2952_s16 + $0x4] ss:$16 sps:$4 sm:$0xff]   ;;  %v2430_v5 = vld [vmem:[%s2952_s16 + $0xc] ss:$16 sps:$4 sm:$0xff]   ;;  %v3518_v6 = vmov 0   ;;  %p2301_p2 = scmp.ne.s32.totalorder %s2810_s13, 2 }
  0x70   : > { %708 = vmatprep.mubr.bf16.mxu0 %v3518_v6  ;;  %761 = vmatprep.mubr.bf16.mxu1 %v3518_v6  ;;  %v2432_v7 = vld [vmem:[%s2952_s16] ss:$16 sps:$4 sm:$0xff]   ;;  %v2433_v8 = vld [vmem:[%s2952_s16 + $0x8] ss:$16 sps:$4 sm:$0xff]   ;;  %v2434_v9 = vld [vmem:[%s2952_s16 + $0x24] ss:$16 sps:$4 sm:$0xff]  }
  0x71   : > { %676 = vmatprep.subr.bf16.mxu0 %v2428_v4  ;;  %729 = vmatprep.subr.bf16.mxu1 %v2430_v5  ;;  %v2436_v10 = vld [vmem:[%s2952_s16 + $0x2c] ss:$16 sps:$4 sm:$0xff]   ;;  %v2438_v11 = vld [vmem:[%s2952_s16 + $0x20] ss:$16 sps:$4 sm:$0xff]   ;;  %v2439_v12 = vld [vmem:[%s2952_s16 + $0x28] ss:$16 sps:$4 sm:$0xff]  }
  0x72   : > { %677 = vmatpush1.bf16.msra.mxu0 %v2432_v7  ;;  %730 = vmatpush1.bf16.msra.mxu1 %v2433_v8  ;;  %v2440_v13 = vld [vmem:[%s2952_s16 + $0x44] ss:$16 sps:$4 sm:$0xff]   ;;  %v2442_v14 = vld [vmem:[%s2952_s16 + $0x4c] ss:$16 sps:$4 sm:$0xff]   ;;  %v2444_v15 = vld [vmem:[%s2952_s16 + $0x40] ss:$16 sps:$4 sm:$0xff]  }
  0x73   : > { %678 = vmatprep.subr.bf16.mxu0 %v2434_v9  ;;  %731 = vmatprep.subr.bf16.mxu1 %v2436_v10  ;;  %v2445_v16 = vld [vmem:[%s2952_s16 + $0x48] ss:$16 sps:$4 sm:$0xff]   ;;  %v2446_v17 = vld [vmem:[%s2952_s16 + $0x64] ss:$16 sps:$4 sm:$0xff]   ;;  %v2448_v18 = vld [vmem:[%s2952_s16 + $0x6c] ss:$16 sps:$4 sm:$0xff]  }
  0x74   : > { %v2450_v19 = vld [vmem:[%s2952_s16 + $0x60] ss:$16 sps:$4 sm:$0xff]   ;;  %v2451_v20 = vld [vmem:[%s2952_s16 + $0x68] ss:$16 sps:$4 sm:$0xff]   ;;  %v2452_v21 = vld [vmem:[%s2952_s16 + $0x84] ss:$16 sps:$4 sm:$0xff]  }
  0x75   : > { %v2454_v22 = vld [vmem:[%s2952_s16 + $0x8c] ss:$16 sps:$4 sm:$0xff]   ;;  %v2456_v23 = vld [vmem:[%s2952_s16 + $0x80] ss:$16 sps:$4 sm:$0xff]   ;;  %v2457_v24 = vld [vmem:[%s2952_s16 + $0x88] ss:$16 sps:$4 sm:$0xff]  }
  0x76   : > { %679 = vmatpush1.bf16.msra.mxu0 %v2438_v11  ;;  %732 = vmatpush1.bf16.msra.mxu1 %v2439_v12  ;;  %v2458_v25 = vld [vmem:[%s2952_s16 + $0xa4] ss:$16 sps:$4 sm:$0xff]   ;;  %v2460_v26 = vld [vmem:[%s2952_s16 + $0xac] ss:$16 sps:$4 sm:$0xff]   ;;  %v2462_v27 = vld [vmem:[%s2952_s16 + $0xa0] ss:$16 sps:$4 sm:$0xff]  }
  0x77   : > { %680 = vmatprep.subr.bf16.mxu0 %v2440_v13  ;;  %733 = vmatprep.subr.bf16.mxu1 %v2442_v14  ;;  %v2463_v28 = vld [vmem:[%s2952_s16 + $0xa8] ss:$16 sps:$4 sm:$0xff]   ;;  %v2464_v29 = vld [vmem:[%s2952_s16 + $0xc4] ss:$16 sps:$4 sm:$0xff]   ;;  %v2466_v30 = vld [vmem:[%s2952_s16 + $0xcc] ss:$16 sps:$4 sm:$0xff]  }
  0x78   : > { %v2468_v31 = vld [vmem:[%s2952_s16 + $0xc0] ss:$16 sps:$4 sm:$0xff]   ;;  %v2469_v32 = vld [vmem:[%s2952_s16 + $0xc8] ss:$16 sps:$4 sm:$0xff]   ;;  %v2470_v33 = vld [vmem:[%s2952_s16 + $0xe4] ss:$16 sps:$4 sm:$0xff]  }
  0x79   : > { %v2472_v34 = vld [vmem:[%s2952_s16 + $0xec] ss:$16 sps:$4 sm:$0xff]   ;;  %v2474_v35 = vld [vmem:[%s2952_s16 + $0xe0] ss:$16 sps:$4 sm:$0xff]   ;;  %v2475_v36 = vld [vmem:[%s2952_s16 + $0xe8] ss:$16 sps:$4 sm:$0xff]  }
  0x7a   : > { %681 = vmatpush1.bf16.msra.mxu0 %v2444_v15  ;;  %734 = vmatpush1.bf16.msra.mxu1 %v2445_v16  ;;  %v510_v37 = vld [vmem:[#allocation2] sm:$0xff]  ;;  %v511_v38 = vld [vmem:[#allocation2 + $0x8] sm:$0xff]  ;;  %v512_v50 = vld [vmem:[#allocation2 + $0x10] sm:$0xff]  ;;  %vm1385_vm0 = vcmask (!%p2301_p2), 1041409   ;;  %vm1388_vm1 = vcmask (!%p2301_p2), 1042434   ;;  %vm2736_vm2 = vmmov (!%p2301_p2), 0  }
  0x7b   : > { %682 = vmatprep.subr.bf16.mxu0 %v2446_v17  ;;  %735 = vmatprep.subr.bf16.mxu1 %v2448_v18  ;;  %v3030_v39 = vld [vmem:[%s2959_s15 + $0x4] ss:$16 sps:$4 sm:$0xff]   ;;  %v3033_v40 = vld [vmem:[%s2959_s15 + $0xc] ss:$16 sps:$4 sm:$0xff]   ;;  %v514_v41 = vpack.c.bf16 %v511_v38, %v510_v37  ;;  %v3036_v42 = vld [vmem:[%s2959_s15] ss:$16 sps:$4 sm:$0xff]  }
  0x7c   : > { %v3039_v43 = vld [vmem:[%s2959_s15 + $0x8] ss:$16 sps:$4 sm:$0xff]   ;;  %v3042_v44 = vld [vmem:[%s2959_s15 + $0x24] ss:$16 sps:$4 sm:$0xff]   ;;  %v3047_v45 = vld [vmem:[%s2959_s15 + $0x2c] ss:$16 sps:$4 sm:$0xff]  }
  0x7d   : > { %v3050_v46 = vld [vmem:[%s2959_s15 + $0x20] ss:$16 sps:$4 sm:$0xff]   ;;  %v3053_v47 = vld [vmem:[%s2959_s15 + $0x28] ss:$16 sps:$4 sm:$0xff]   ;;  %v3058_v48 = vld [vmem:[%s2959_s15 + $0x44] ss:$16 sps:$4 sm:$0xff]  }
  0x7e   : > { %683 = vmatpush1.bf16.msra.mxu0 %v2450_v19  ;;  %736 = vmatpush1.bf16.msra.mxu1 %v2451_v20  ;;  %v3063_v49 = vld [vmem:[%s2959_s15 + $0x4c] ss:$16 sps:$4 sm:$0xff]   ;;  %v3068_v52 = vld [vmem:[%s2959_s15 + $0x40] ss:$16 sps:$4 sm:$0xff]   ;;  %v3073_v54 = vld [vmem:[%s2959_s15 + $0x48] ss:$16 sps:$4 sm:$0xff]  }
  0x7f   : > { %684 = vmatprep.subr.bf16.mxu0 %v2452_v21  ;;  %737 = vmatprep.subr.bf16.mxu1 %v2454_v22  ;;  %v513_v51 = vld [vmem:[#allocation2 + $0x18] sm:$0xff]  ;;  %v3076_v55 = vld [vmem:[%s2959_s15 + $0x64] ss:$16 sps:$4 sm:$0xff]   ;;  %v3086_v57 = vld [vmem:[%s2959_s15 + $0x60] ss:$16 sps:$4 sm:$0xff]   ;;  %vm1391_vm3 = vcmask (!%p2301_p2), 1043459  }
  0x80   : > { %v515_v53 = vpack.c.bf16 %v513_v51, %v512_v50  ;;  %v3081_v56 = vld [vmem:[%s2959_s15 + $0x6c] ss:$16 sps:$4 sm:$0xff]   ;;  %v3089_v58 = vld [vmem:[%s2959_s15 + $0x68] ss:$16 sps:$4 sm:$0xff]   ;;  %v3094_v59 = vld [vmem:[%s2959_s15 + $0x84] ss:$16 sps:$4 sm:$0xff]  }
  0x81   : > { %v3097_v60 = vld [vmem:[%s2959_s15 + $0x8c] ss:$16 sps:$4 sm:$0xff]   ;;  %v3104_v61 = vld [vmem:[%s2959_s15 + $0x80] ss:$16 sps:$4 sm:$0xff]   ;;  %v3107_v62 = vld [vmem:[%s2959_s15 + $0x88] ss:$16 sps:$4 sm:$0xff]  }
  0x82   : > { %685 = vmatpush1.bf16.msra.mxu0 %v2456_v23  ;;  %738 = vmatpush1.bf16.msra.mxu1 %v2457_v24  ;;  %v3112_v63 = vld [vmem:[%s2959_s15 + $0xa4] ss:$16 sps:$4 sm:$0xff]   ;;  %v3115_v0 = vld [vmem:[%s2959_s15 + $0xac] ss:$16 sps:$4 sm:$0xff]   ;;  %v3120_v1 = vld [vmem:[%s2959_s15 + $0xa0] ss:$16 sps:$4 sm:$0xff]  }
  0x83   : > { %686 = vmatprep.subr.bf16.mxu0 %v2458_v25  ;;  %739 = vmatprep.subr.bf16.mxu1 %v2460_v26  ;;  %v3123_v2 = vld [vmem:[%s2959_s15 + $0xa8] ss:$16 sps:$4 sm:$0xff]   ;;  %v3128_v3 = vld [vmem:[%s2959_s15 + $0xc4] ss:$16 sps:$4 sm:$0xff]   ;;  %v3131_v4 = vld [vmem:[%s2959_s15 + $0xcc] ss:$16 sps:$4 sm:$0xff]  }
  0x84   : > { %v3136_v5 = vld [vmem:[%s2959_s15 + $0xc0] ss:$16 sps:$4 sm:$0xff]   ;;  %v3139_v7 = vld [vmem:[%s2959_s15 + $0xc8] ss:$16 sps:$4 sm:$0xff]   ;;  %v3144_v8 = vld [vmem:[%s2959_s15 + $0xe4] ss:$16 sps:$4 sm:$0xff]  }
  0x85   : > { %v3147_v9 = vld [vmem:[%s2959_s15 + $0xec] ss:$16 sps:$4 sm:$0xff]   ;;  %v3152_v10 = vld [vmem:[%s2959_s15 + $0xe0] ss:$16 sps:$4 sm:$0xff]   ;;  %v3155_v11 = vld [vmem:[%s2959_s15 + $0xe8] ss:$16 sps:$4 sm:$0xff]  }
  0x86   : > { %687 = vmatpush1.bf16.msra.mxu0 %v2462_v27  ;;  %740 = vmatpush1.bf16.msra.mxu1 %v2463_v28  ;;  %v782_v12 = vld [vmem:[%s2971_s18] sm:$0xff]  ;;  %vm2031_vm4 = vcmask (!%p2301_p2), 11264  }
  0x87   : > { %688 = vmatprep.subr.bf16.mxu0 %v2464_v29  ;;  %741 = vmatprep.subr.bf16.mxu1 %v2466_v30  ;;  %v784_v13 = vpack.c.bf16 %v782_v12, %v782_v12 }
  0x8a   : > { %689 = vmatpush1.bf16.msra.mxu0 %v2468_v31  ;;  %742 = vmatpush1.bf16.msra.mxu1 %v2469_v32 }
  0x8b   : > { %690 = vmatprep.subr.bf16.mxu0 %v2470_v33  ;;  %743 = vmatprep.subr.bf16.mxu1 %v2472_v34 }
  0x8e   : > { %691 = vmatpush1.bf16.msra.mxu0 %v2474_v35  ;;  %744 = vmatpush1.bf16.msra.mxu1 %v2475_v36 }
  0x8f   : > { %945 = vmatprep.subr.bf16.mxu0 %v3030_v39  ;;  %986 = vmatprep.subr.bf16.mxu1 %v3033_v40 }
  0x91   : > { %709 = vmatmul.mubr.bf16.vlgmr.msra.gmra.mrb[0].mxu0 %v514_v41  ;;  %762 = vmatmul.mubr.bf16.vlgmr.msra.gmra.mrb[0].mxu1 %v514_v41 }
  0x92   : > { %946 = vmatpush1.bf16.msra.mxu0 %v3036_v42  ;;  %987 = vmatpush1.bf16.msra.mxu1 %v3039_v43 }
  0x93   : > { %947 = vmatprep.subr.bf16.mxu0 %v3042_v44  ;;  %988 = vmatprep.subr.bf16.mxu1 %v3047_v45 }
  0x94   : > { %718 = vmatprep.mubr.bf16.mxu0 %v3518_v6  ;;  %771 = vmatprep.mubr.bf16.mxu1 %v3518_v6 }
  0x96   : > { %948 = vmatpush1.bf16.msra.mxu0 %v3050_v46  ;;  %989 = vmatpush1.bf16.msra.mxu1 %v3053_v47 }
  0x97   : > { %949 = vmatprep.subr.bf16.mxu0 %v3058_v48  ;;  %990 = vmatprep.subr.bf16.mxu1 %v3063_v49 }
  0x99   : > { %719 = vmatmul.mubr.bf16.gmra.mrb[4].mxu0 %v515_v53  ;;  %772 = vmatmul.mubr.bf16.gmra.mrb[4].mxu1 %v515_v53 }
  0x9a   : > { %950 = vmatpush1.bf16.msra.mxu0 %v3068_v52  ;;  %991 = vmatpush1.bf16.msra.mxu1 %v3073_v54 }
  0x9b   : > { %951 = vmatprep.subr.bf16.mxu0 %v3076_v55  ;;  %992 = vmatprep.subr.bf16.mxu1 %v3081_v56 }
  0x9c   : > { %977 = vmatprep.mubr.bf16.mxu0 %v3518_v6  ;;  %1018 = vmatprep.mubr.bf16.mxu1 %v3518_v6 }
  0x9e   : > { %952 = vmatpush1.bf16.msra.mxu0 %v3086_v57  ;;  %993 = vmatpush1.bf16.msra.mxu1 %v3089_v58 }
  0x9f   : > { %953 = vmatprep.subr.bf16.mxu0 %v3094_v59  ;;  %994 = vmatprep.subr.bf16.mxu1 %v3097_v60 }
  0xa2   : > { %954 = vmatpush1.bf16.msra.mxu0 %v3104_v61  ;;  %995 = vmatpush1.bf16.msra.mxu1 %v3107_v62 }
  0xa3   : > { %955 = vmatprep.subr.bf16.mxu0 %v3112_v63  ;;  %996 = vmatprep.subr.bf16.mxu1 %v3115_v0 }
  0xa6   : > { %956 = vmatpush1.bf16.msra.mxu0 %v3120_v1  ;;  %997 = vmatpush1.bf16.msra.mxu1 %v3123_v2 }
  0xa7   : > { %957 = vmatprep.subr.bf16.mxu0 %v3128_v3  ;;  %998 = vmatprep.subr.bf16.mxu1 %v3131_v4 }
  0xaa   : > { %958 = vmatpush1.bf16.msra.mxu0 %v3136_v5  ;;  %999 = vmatpush1.bf16.msra.mxu1 %v3139_v7 }
  0xab   : > { %959 = vmatprep.subr.bf16.mxu0 %v3144_v8  ;;  %1000 = vmatprep.subr.bf16.mxu1 %v3147_v9 }
  0xae   : > { %960 = vmatpush1.bf16.msra.mxu0 %v3152_v10  ;;  %1001 = vmatpush1.bf16.msra.mxu1 %v3155_v11 }
  0xaf   : > { %1051 = vmatprep.subr.bf16.mxu0 %v3030_v39  ;;  %1092 = vmatprep.subr.bf16.mxu1 %v3033_v40 }
  0xb1   : > { %978 = vmatmul.mubr.bf16.vlgmr.msra.gmra.mrb[8].mxu0 %v784_v13  ;;  %1019 = vmatmul.mubr.bf16.vlgmr.msra.gmra.mrb[8].mxu1 %v784_v13 }
  0xb2   : > { %1052 = vmatpush1.bf16.msra.mxu0 %v3036_v42  ;;  %1093 = vmatpush1.bf16.msra.mxu1 %v3039_v43 }
  0xb3   : > { %1053 = vmatprep.subr.bf16.mxu0 %v3042_v44  ;;  %1094 = vmatprep.subr.bf16.mxu1 %v3047_v45 }
  0xb4   : > { %1083 = vmatprep.mubr.bf16.mxu0 %v3518_v6  ;;  %1124 = vmatprep.mubr.bf16.mxu1 %v3518_v6 }
  0xb6   : > { %1054 = vmatpush1.bf16.msra.mxu0 %v3050_v46  ;;  %1095 = vmatpush1.bf16.msra.mxu1 %v3053_v47 }
  0xb7   : > { %1055 = vmatprep.subr.bf16.mxu0 %v3058_v48  ;;  %1096 = vmatprep.subr.bf16.mxu1 %v3063_v49 }
  0xba   : > { %1056 = vmatpush1.bf16.msra.mxu0 %v3068_v52  ;;  %1097 = vmatpush1.bf16.msra.mxu1 %v3073_v54 }
  0xbb   : > { %1057 = vmatprep.subr.bf16.mxu0 %v3076_v55  ;;  %1098 = vmatprep.subr.bf16.mxu1 %v3081_v56 }
  0xbe   : > { %1058 = vmatpush1.bf16.msra.mxu0 %v3086_v57  ;;  %1099 = vmatpush1.bf16.msra.mxu1 %v3089_v58 }
  0xbf   : > { %1059 = vmatprep.subr.bf16.mxu0 %v3094_v59  ;;  %1100 = vmatprep.subr.bf16.mxu1 %v3097_v60 }
  0xc2   : > { %1060 = vmatpush1.bf16.msra.mxu0 %v3104_v61  ;;  %1101 = vmatpush1.bf16.msra.mxu1 %v3107_v62 }
  0xc3   : > { %1061 = vmatprep.subr.bf16.mxu0 %v3112_v63  ;;  %1102 = vmatprep.subr.bf16.mxu1 %v3115_v0 }
  0xc6   : > { %1062 = vmatpush1.bf16.msra.mxu0 %v3120_v1  ;;  %1103 = vmatpush1.bf16.msra.mxu1 %v3123_v2 }
  0xc7   : > { %1063 = vmatprep.subr.bf16.mxu0 %v3128_v3  ;;  %1104 = vmatprep.subr.bf16.mxu1 %v3131_v4 }
  0xca   : > { %1064 = vmatpush1.bf16.msra.mxu0 %v3136_v5  ;;  %1105 = vmatpush1.bf16.msra.mxu1 %v3139_v7 }
  0xcb   : > { %1065 = vmatprep.subr.bf16.mxu0 %v3144_v8  ;;  %1106 = vmatprep.subr.bf16.mxu1 %v3147_v9 }
  0xce   : > { %1066 = vmatpush1.bf16.msra.mxu0 %v3152_v10  ;;  %1107 = vmatpush1.bf16.msra.mxu1 %v3155_v11 }
  0xcf   : > { %1157 = vmatprep.subr.bf16.mxu0 %v3030_v39  ;;  %1198 = vmatprep.subr.bf16.mxu1 %v3033_v40 }
 0x164   : > { %v710_v14 = vpop.f32.mrb[0].mxu0  ;;  %v763_v15 = vpop.f32.mrb[0].mxu1 }
 0x165   : > { %v712_v16 = vpop.f32.mrb[1].mxu0  ;;  %v765_v17 = vpop.f32.mrb[1].mxu1 }
 0x166   : > { %v3198_v18 = vpop.f32.mrb[2].mxu0  ;;  %v3200_v19 = vpop.f32.mrb[2].mxu1 }
 0x167   : > { %v3202_v20 = vpop.f32.mrb[3].mxu0  ;;  %v3204_v21 = vpop.f32.mrb[3].mxu1 }
 0x16c   : > { %v3206_v22 = vpop.f32.mrb[4].mxu0  ;;  %v3208_v23 = vpop.f32.mrb[4].mxu1 }
 0x16d   : > { %v3210_v24 = vpop.f32.mrb[5].mxu0  ;;  %v3212_v25 = vpop.f32.mrb[5].mxu1 }
 0x16e   : > { %v3214_v26 = vpop.f32.mrb[6].mxu0  ;;  %v3216_v27 = vpop.f32.mrb[6].mxu1 }
 0x16f   : > { %v3218_v28 = vpop.f32.mrb[7].mxu0  ;;  %v3220_v29 = vpop.f32.mrb[7].mxu1 }
 0x170   : > { %3538 = vst [vmem:[#allocation18_spill] sm:$0xff] %v3218_v28  ;;  %3539 = vst [vmem:[#allocation19_spill] sm:$0xff] %v3220_v29 }
 0x184   : > { %v979_v30 = vpop.f32.mrb[8].mxu0  ;;  %v1020_v31 = vpop.f32.mrb[8].mxu1 }
 0x185   : > { %v1027_v32 = vadd.f32 %v979_v30, %v710_v14  ;;  %v1029_v33 = vadd.f32 %v1020_v31, %v763_v15  ;;  %v981_v34 = vpop.f32.mrb[9].mxu0  ;;  %v1022_v35 = vpop.f32.mrb[9].mxu1 }
 0x186   : > { %v1028_v36 = vadd.f32 %v981_v34, %v712_v16  ;;  %v1030_v37 = vadd.f32 %v1022_v35, %v765_v17  ;;  %v983_v38 = vpop.f32.mrb[10].mxu0  ;;  %v1024_v41 = vpop.f32.mrb[10].mxu1  ;;  %v783_v16 = vld [vmem:[%s2976_s14] sm:$0xff] }
 0x187   : > { %v1031_v50 = vmul.f32 0.5, %v1027_v32  ;;  %v984_v51 = vpop.f32.mrb[11].mxu0  ;;  %v1025_v53 = vpop.f32.mrb[11].mxu1  ;;  %v1033_v13 = vmul.f32 0.5, %v1029_v33 }
 0x188   : > { %v1032_v12 = vmul.f32 0.5, %v1028_v36 }
 0x189   : > { %2524 = vtanh.f32 %v1031_v50 }
 0x18a   : > { %2526 = vtanh.f32 %v1032_v12 }
 0x18b   : > { %2528 = vtanh.f32 %v1030_v37 }
 0x18c   : > { %2530 = vtanh.f32 %v1033_v13 }
 0x193   : > { %v2525_v6 = vpop.eup %2524 }
 0x194   : > { %v1037_v29 = vadd.f32 1.0, %v2525_v6  ;;  %v2527_v28 = vpop.eup %2526 }
 0x195   : > { %v1038_v15 = vadd.f32 1.0, %v2527_v28  ;;  %v2529_v30 = vpop.eup %2528  ;;  %v3540_v28 = vmov 0  }
 0x196   : > { %v1040_v14 = vmul.f32 0.5, %v1037_v29  ;;  %v2531_v32 = vpop.eup %2530 }
 0x197   : > { %v1041_v17 = vmul.f32 0.5, %v1038_v15  ;;  %v1039_v36 = vadd.f32 1.0, %v2531_v32 }
 0x198   : > { %v1045_v31 = vmul.f32 %v2529_v30, %v1040_v14 }
 0x199   : > { %v1044_v34 = vmul.f32 %v1041_v17, %v783_v16  ;;  %v1042_v38 = vmul.f32 0.5, %v1039_v36 }
 0x19b   : > { %v3223_v35 = vadd.f32 %v1045_v31, %v1044_v34 }
 0x19d   : > { %2532 = vtanh.f32 %v3223_v35 }
 0x1a7   : > { %v2533_v37 = vpop.eup %2532 }
 0x1a8   : > { %v1048_v33 = vmul.f32 %v2533_v37, %v1042_v38 }
 0x1aa   : > { %1049 = vst [vmem:[#allocation2] sm:$0xff] %v1048_v33  ;;  %v1050_v6 = vpack.c.bf16 %v1048_v33, %v1048_v33 }
 0x1ac   : > { %1084 = vmatmul.mubr.bf16.vlgmr.msra.gmra.mrb[12].mxu0 %v1050_v6  ;;  %1125 = vmatmul.mubr.bf16.vlgmr.msra.gmra.mrb[12].mxu1 %v1050_v6 }
 0x1ad   : > { %1158 = vmatpush1.bf16.msra.mxu0 %v3036_v42  ;;  %1199 = vmatpush1.bf16.msra.mxu1 %v3039_v43 }
 0x1ae   : > { %1159 = vmatprep.subr.bf16.mxu0 %v3042_v44  ;;  %1200 = vmatprep.subr.bf16.mxu1 %v3047_v45 }
 0x1af   : > { %1189 = vmatprep.mubr.bf16.mxu0 %v3540_v28  ;;  %1230 = vmatprep.mubr.bf16.mxu1 %v3540_v28 }
 0x1b1   : > { %1160 = vmatpush1.bf16.msra.mxu0 %v3050_v46  ;;  %1201 = vmatpush1.bf16.msra.mxu1 %v3053_v47 }
 0x1b2   : > { %1161 = vmatprep.subr.bf16.mxu0 %v3058_v48  ;;  %1202 = vmatprep.subr.bf16.mxu1 %v3063_v49 }
 0x1b5   : > { %1162 = vmatpush1.bf16.msra.mxu0 %v3068_v52  ;;  %1203 = vmatpush1.bf16.msra.mxu1 %v3073_v54 }
 0x1b6   : > { %1163 = vmatprep.subr.bf16.mxu0 %v3076_v55  ;;  %1204 = vmatprep.subr.bf16.mxu1 %v3081_v56 }
 0x1b9   : > { %1164 = vmatpush1.bf16.msra.mxu0 %v3086_v57  ;;  %1205 = vmatpush1.bf16.msra.mxu1 %v3089_v58 }
 0x1ba   : > { %1165 = vmatprep.subr.bf16.mxu0 %v3094_v59  ;;  %1206 = vmatprep.subr.bf16.mxu1 %v3097_v60 }
 0x1bd   : > { %1166 = vmatpush1.bf16.msra.mxu0 %v3104_v61  ;;  %1207 = vmatpush1.bf16.msra.mxu1 %v3107_v62 }
 0x1be   : > { %1167 = vmatprep.subr.bf16.mxu0 %v3112_v63  ;;  %1208 = vmatprep.subr.bf16.mxu1 %v3115_v0 }
 0x1c1   : > { %1168 = vmatpush1.bf16.msra.mxu0 %v3120_v1  ;;  %1209 = vmatpush1.bf16.msra.mxu1 %v3123_v2 }
 0x1c2   : > { %1169 = vmatprep.subr.bf16.mxu0 %v3128_v3  ;;  %1210 = vmatprep.subr.bf16.mxu1 %v3131_v4 }
 0x1c5   : > { %1170 = vmatpush1.bf16.msra.mxu0 %v3136_v5  ;;  %1211 = vmatpush1.bf16.msra.mxu1 %v3139_v7 }
 0x1c6   : > { %1171 = vmatprep.subr.bf16.mxu0 %v3144_v8  ;;  %1212 = vmatprep.subr.bf16.mxu1 %v3147_v9 }
 0x1c9   : > { %1172 = vmatpush1.bf16.msra.mxu0 %v3152_v10  ;;  %1213 = vmatpush1.bf16.msra.mxu1 %v3155_v11 }
 0x1ca   : > { %1263 = vmatprep.subr.bf16.mxu0 %v3030_v39  ;;  %1304 = vmatprep.subr.bf16.mxu1 %v3033_v40 }
 0x27f   : > { %v1085_v29 = vpop.f32.mrb[12].mxu0  ;;  %v1126_v41 = vpop.f32.mrb[12].mxu1 }
 0x280   : > { %v1133_v50 = vadd.f32 %v1085_v29, %v3198_v18  ;;  %v1135_v51 = vadd.f32 %v1126_v41, %v3200_v19  ;;  %v1087_v53 = vpop.f32.mrb[13].mxu0  ;;  %v1128_v12 = vpop.f32.mrb[13].mxu1 }
 0x281   : > { %v1134_v13 = vadd.f32 %v1087_v53, %v3202_v20  ;;  %v1136_v14 = vadd.f32 %v1128_v12, %v3204_v21  ;;  %v1089_v15 = vpop.f32.mrb[14].mxu0  ;;  %v1130_v30 = vpop.f32.mrb[14].mxu1 }
 0x282   : > { %v1137_v16 = vmul.f32 0.5, %v1133_v50  ;;  %v1090_v17 = vpop.f32.mrb[15].mxu0  ;;  %v1131_v31 = vpop.f32.mrb[15].mxu1  ;;  %v1139_v40 = vmul.f32 0.5, %v1135_v51  ;;  %v3542_v15 = vld [vmem:[#allocation19_spill] sm:$0xff] }
 0x283   : > { %v1138_v39 = vmul.f32 0.5, %v1134_v13  ;;  %v3541_v13 = vld [vmem:[#allocation18_spill] sm:$0xff] }
 0x284   : > { %2534 = vtanh.f32 %v1137_v16 }
 0x285   : > { %2536 = vtanh.f32 %v1138_v39 }
 0x286   : > { %2538 = vtanh.f32 %v1136_v14 }
 0x287   : > { %2540 = vtanh.f32 %v1139_v40 }
 0x28e   : > { %v2535_v34 = vpop.eup %2534 }
 0x28f   : > { %v1143_v18 = vadd.f32 1.0, %v2535_v34  ;;  %v2537_v32 = vpop.eup %2536 }
 0x290   : > { %v1144_v36 = vadd.f32 1.0, %v2537_v32  ;;  %v2539_v38 = vpop.eup %2538 }
 0x291   : > { %v1146_v19 = vmul.f32 0.5, %v1143_v18  ;;  %v2541_v6 = vpop.eup %2540 }
 0x292   : > { %v1147_v20 = vmul.f32 0.5, %v1144_v36  ;;  %v1145_v29 = vadd.f32 1.0, %v2541_v6 }
 0x293   : > { %v1151_v37 = vmul.f32 %v2539_v38, %v1146_v19 }
 0x294   : > { %v1150_v21 = vmul.f32 %v1147_v20, %v3223_v35  ;;  %v1148_v41 = vmul.f32 0.5, %v1145_v29 }
 0x296   : > { %v3265_v33 = vadd.f32 %v1151_v37, %v1150_v21 }
 0x298   : > { %2542 = vtanh.f32 %v3265_v33 }
 0x2a2   : > { %v2543_v50 = vpop.eup %2542 }
 0x2a3   : > { %v1154_v51 = vmul.f32 %v2543_v50, %v1148_v41 }
 0x2a5   : > { %1155 = vst [vmem:[#allocation2 + $0x8] sm:$0xff] %v1154_v51  ;;  %v1156_v53 = vpack.c.bf16 %v1154_v51, %v1154_v51 }
 0x2a7   : > { %1190 = vmatmul.mubr.bf16.vlgmr.msra.gmra.mrb[16].mxu0 %v1156_v53  ;;  %1231 = vmatmul.mubr.bf16.vlgmr.msra.gmra.mrb[16].mxu1 %v1156_v53  ;;  %v1379_v53 = vld [vmem:[%s3505_s5 + $0x2] sm:$0x3] (!%p2301_p2) }
 0x2a8   : > { %1264 = vmatpush1.bf16.msra.mxu0 %v3036_v42  ;;  %1305 = vmatpush1.bf16.msra.mxu1 %v3039_v43 }
 0x2a9   : > { %1265 = vmatprep.subr.bf16.mxu0 %v3042_v44  ;;  %1306 = vmatprep.subr.bf16.mxu1 %v3047_v45 }
 0x2aa   : > { %1295 = vmatprep.mubr.bf16.mxu0 %v3540_v28  ;;  %1336 = vmatprep.mubr.bf16.mxu1 %v3540_v28 }
 0x2ac   : > { %1266 = vmatpush1.bf16.msra.mxu0 %v3050_v46  ;;  %1307 = vmatpush1.bf16.msra.mxu1 %v3053_v47 }
 0x2ad   : > { %1267 = vmatprep.subr.bf16.mxu0 %v3058_v48  ;;  %1308 = vmatprep.subr.bf16.mxu1 %v3063_v49 }
 0x2b0   : > { %1268 = vmatpush1.bf16.msra.mxu0 %v3068_v52  ;;  %1309 = vmatpush1.bf16.msra.mxu1 %v3073_v54 }
 0x2b1   : > { %1269 = vmatprep.subr.bf16.mxu0 %v3076_v55  ;;  %1310 = vmatprep.subr.bf16.mxu1 %v3081_v56 }
 0x2b4   : > { %1270 = vmatpush1.bf16.msra.mxu0 %v3086_v57  ;;  %1311 = vmatpush1.bf16.msra.mxu1 %v3089_v58 }
 0x2b5   : > { %1271 = vmatprep.subr.bf16.mxu0 %v3094_v59  ;;  %1312 = vmatprep.subr.bf16.mxu1 %v3097_v60 }
 0x2b8   : > { %1272 = vmatpush1.bf16.msra.mxu0 %v3104_v61  ;;  %1313 = vmatpush1.bf16.msra.mxu1 %v3107_v62 }
 0x2b9   : > { %1273 = vmatprep.subr.bf16.mxu0 %v3112_v63  ;;  %1314 = vmatprep.subr.bf16.mxu1 %v3115_v0 }
 0x2bc   : > { %1274 = vmatpush1.bf16.msra.mxu0 %v3120_v1  ;;  %1315 = vmatpush1.bf16.msra.mxu1 %v3123_v2 }
 0x2bd   : > { %1275 = vmatprep.subr.bf16.mxu0 %v3128_v3  ;;  %1316 = vmatprep.subr.bf16.mxu1 %v3131_v4 }
 0x2c0   : > { %1276 = vmatpush1.bf16.msra.mxu0 %v3136_v5  ;;  %1317 = vmatpush1.bf16.msra.mxu1 %v3139_v7 }
 0x2c1   : > { %1277 = vmatprep.subr.bf16.mxu0 %v3144_v8  ;;  %1318 = vmatprep.subr.bf16.mxu1 %v3147_v9 }
 0x2c4   : > { %1278 = vmatpush1.bf16.msra.mxu0 %v3152_v10  ;;  %1319 = vmatpush1.bf16.msra.mxu1 %v3155_v11 }
 0x37a   : > { %v1191_v42 = vpop.f32.mrb[16].mxu0  ;;  %v1232_v43 = vpop.f32.mrb[16].mxu1 }
 0x37b   : > { %v1239_v44 = vadd.f32 %v1191_v42, %v3206_v22  ;;  %v1241_v45 = vadd.f32 %v1232_v43, %v3208_v23  ;;  %v1193_v46 = vpop.f32.mrb[17].mxu0  ;;  %v1234_v47 = vpop.f32.mrb[17].mxu1  ;;  %v1378_v42 = vld [vmem:[%s3505_s5] sm:$0x3] (!%p2301_p2)  ;;  %v2735_v43 = vmov (!%p2301_p2), 0.0  }
 0x37c   : > { %v1240_v48 = vadd.f32 %v1193_v46, %v3210_v24  ;;  %v1242_v49 = vadd.f32 %v1234_v47, %v3212_v25  ;;  %v1195_v52 = vpop.f32.mrb[18].mxu0  ;;  %v1236_v54 = vpop.f32.mrb[18].mxu1  ;;  %2327 = vmatprep.subr.mxu0 (!%p2301_p2), %v2735_v43  ;;  %2332 = vmatprep.subr.mxu1 (!%p2301_p2), %v2735_v43 }
 0x37d   : > { %v1243_v55 = vmul.f32 0.5, %v1239_v44  ;;  %v1196_v56 = vpop.f32.mrb[19].mxu0  ;;  %v1237_v57 = vpop.f32.mrb[19].mxu1  ;;  %v1245_v59 = vmul.f32 0.5, %v1241_v45  ;;  %v3320_v44 = vld [vmem:[#allocation2] sm:$0xff] (!%p2301_p2)  ;;  %v3322_v45 = vld [vmem:[#allocation2 + $0x8] sm:$0xff] (!%p2301_p2) }
 0x37e   : > { %v1244_v58 = vmul.f32 0.5, %v1240_v48  ;;  %v1384_v48 = vrot.slane (!%p2301_p2), %v3320_v44, 1  ;;  %v1464_v52 = vrot.slane (!%p2301_p2), %v3322_v45, 7 }
 0x37f   : > { %2544 = vtanh.f32 %v1243_v55 }
 0x380   : > { %2546 = vtanh.f32 %v1244_v58  ;;  %v1386_v57 = vsel (!%p2301_p2), %vm1385_vm0, %v3322_v45, %v1384_v48  ;;  %v1465_v58 = vsel (!%p2301_p2), %vm1385_vm0, %v1464_v52, %v3320_v44 }
 0x381   : > { %2548 = vtanh.f32 %v1242_v49 }
 0x382   : > { %2550 = vtanh.f32 %v1245_v59  ;;  %v1542_v59 = vrot.slane (!%p2301_p2), %v3320_v44, 2 }
 0x389   : > { %v2545_v60 = vpop.eup %2544 }
 0x38a   : > { %v1249_v61 = vadd.f32 1.0, %v2545_v60  ;;  %v2547_v62 = vpop.eup %2546  ;;  %v1543_v60 = vrot.slane (!%p2301_p2), %v3322_v45, 1 }
 0x38b   : > { %v1250_v0 = vadd.f32 1.0, %v2547_v62  ;;  %v2549_v1 = vpop.eup %2548 }
 0x38c   : > { %v1252_v63 = vmul.f32 0.5, %v1249_v61  ;;  %v2551_v7 = vpop.eup %2550 }
 0x38d   : > { %v1253_v2 = vmul.f32 0.5, %v1250_v0  ;;  %v1251_v8 = vadd.f32 1.0, %v2551_v7  ;;  %v1620_v0 = vld [vmem:[%s3505_s5 + $0x6] sm:$0x3] (!%p2301_p2)  ;;  %v1622_v7 = vrot.slane (!%p2301_p2), %v3322_v45, 2 }
 0x38e   : > { %v1257_v3 = vmul.f32 %v2549_v1, %v1252_v63  ;;  %v1541_v63 = vld [vmem:[%s3505_s5 + $0x4] sm:$0x3] (!%p2301_p2) }
 0x38f   : > { %v1256_v4 = vmul.f32 %v1253_v2, %v3265_v33  ;;  %v1254_v9 = vmul.f32 0.5, %v1251_v8  ;;  %v1621_v2 = vrot.slane (!%p2301_p2), %v3320_v44, 3 }
 0x391   : > { %v1258_v5 = vadd.f32 %v1257_v3, %v1256_v4 }
 0x393   : > { %2552 = vtanh.f32 %v1258_v5 }
 0x39d   : > { %v2553_v10 = vpop.eup %2552 }
 0x39e   : > { %v1260_v11 = vmul.f32 %v2553_v10, %v1254_v9  ;;  %v1700_v10 = vrot.slane (!%p2301_p2), %v3320_v44, 4 }
 0x3a0   : > { %1261 = vst [vmem:[#allocation2 + $0x10] sm:$0xff] %v1260_v11  ;;  %v1262_v22 = vpack.c.bf16 %v1260_v11, %v1260_v11  ;;  %v1701_v11 = vrot.slane (!%p2301_p2), %v3322_v45, 3 }
 0x3a2   : > { %1296 = vmatmul.mubr.bf16.vlgmr.msra.gmra.mrb[20].mxu0 %v1262_v22  ;;  %1337 = vmatmul.mubr.bf16.vlgmr.msra.gmra.mrb[20].mxu1 %v1262_v22 }
 0x3a3   : > { %2328 = vmatpush3.xpose.msra.mxu0 (!%p2301_p2), %v1379_v53  ;;  %2333 = vmatpush3.xpose.msra.mxu1 (!%p2301_p2), %v1378_v42 }
 0x3a4   : > { %2329 = vmatprep.mubr.msk.f32.mxu0 (!%p2301_p2), %vm2736_vm2, %v2735_v43  ;;  %2334 = vmatprep.mubr.msk.f32.mxu1 (!%p2301_p2), %vm2736_vm2, %v2735_v43 }
 0x3a5   : > { %2337 = vmatprep.subr.mxu0 (!%p2301_p2), %v2735_v43  ;;  %2342 = vmatprep.subr.mxu1 (!%p2301_p2), %v2735_v43 }
 0x3a7   : > { %v3324_v46 = vld [vmem:[#allocation2 + $0x10] sm:$0xff] (!%p2301_p2) }
 0x3a8   : > { %v1387_v49 = vrot.slane (!%p2301_p2), %v3324_v46, 7  ;;  %v1466_v54 = vrot.slane (!%p2301_p2), %v3324_v46, 6  ;;  %v1624_v9 = vrot.slane (!%p2301_p2), %v3324_v46, 1 }
 0x3aa   : > { %v1389_v61 = vsel (!%p2301_p2), %vm1388_vm1, %v1387_v49, %v1386_v57  ;;  %v1467_v62 = vsel (!%p2301_p2), %vm1388_vm1, %v1466_v54, %v1465_v58 }
 0x475   : > { %v1297_v23 = vpop.f32.mrb[20].mxu0  ;;  %v1338_v24 = vpop.f32.mrb[20].mxu1 }
 0x476   : > { %v1345_v25 = vadd.f32 %v1297_v23, %v3214_v26  ;;  %v1347_v35 = vadd.f32 %v1338_v24, %v3216_v27  ;;  %v1299_v28 = vpop.f32.mrb[21].mxu0  ;;  %v1340_v12 = vpop.f32.mrb[21].mxu1  ;;  %v1623_v23 = vsel (!%p2301_p2), %vm1385_vm0, %v1622_v7, %v1621_v2  ;;  %v1703_v24 = vrot.slane (!%p2301_p2), %v3324_v46, 2 }
 0x477   : > { %v1346_v14 = vadd.f32 %v1299_v28, %v3541_v13  ;;  %v1348_v30 = vadd.f32 %v1340_v12, %v3542_v15  ;;  %v1301_v16 = vpop.f32.mrb[22].mxu0  ;;  %v1342_v17 = vpop.f32.mrb[22].mxu1  ;;  %v1625_v28 = vsel (!%p2301_p2), %vm1388_vm1, %v1624_v9, %v1623_v23  ;;  %v1779_v12 = vld [vmem:[%s3505_s5 + $0xa] sm:$0x3] (!%p2301_p2)  ;;  %v1702_v13 = vsel (!%p2301_p2), %vm1385_vm0, %v1701_v11, %v1700_v10 }
 0x478   : > { %v1349_v31 = vmul.f32 0.5, %v1345_v25  ;;  %v1302_v39 = vpop.f32.mrb[23].mxu0  ;;  %v1343_v40 = vpop.f32.mrb[23].mxu1  ;;  %v1351_v18 = vmul.f32 0.5, %v1347_v35  ;;  %v1699_v35 = vld [vmem:[%s3505_s5 + $0x8] sm:$0x3] (!%p2301_p2)  ;;  %v1704_v16 = vsel (!%p2301_p2), %vm1388_vm1, %v1703_v24, %v1702_v13 }
 0x479   : > { %v1350_v34 = vmul.f32 0.5, %v1346_v14  ;;  %v1780_v14 = vrot.slane (!%p2301_p2), %v3320_v44, 5  ;;  %v1781_v15 = vrot.slane (!%p2301_p2), %v3322_v45, 4  ;;  %v1783_v17 = vrot.slane (!%p2301_p2), %v3324_v46, 3 }
 0x47a   : > { %2554 = vtanh.f32 %v1349_v31 }
 0x47b   : > { %2556 = vtanh.f32 %v1350_v34  ;;  %v1782_v40 = vsel (!%p2301_p2), %vm1385_vm0, %v1781_v15, %v1780_v14  ;;  %v1860_v34 = vrot.slane (!%p2301_p2), %v3320_v44, 6 }
 0x47c   : > { %2558 = vtanh.f32 %v1348_v30 }
 0x47d   : > { %2560 = vtanh.f32 %v1351_v18  ;;  %v1861_v18 = vrot.slane (!%p2301_p2), %v3322_v45, 5 }
 0x484   : > { %v2555_v26 = vpop.eup %2554 }
 0x485   : > { %v1355_v32 = vadd.f32 1.0, %v2555_v26  ;;  %v2557_v27 = vpop.eup %2556  ;;  %v1784_v26 = vsel (!%p2301_p2), %vm1388_vm1, %v1783_v17, %v1782_v40 }
 0x486   : > { %v1356_v36 = vadd.f32 1.0, %v2557_v27  ;;  %v2559_v38 = vpop.eup %2558 }
 0x487   : > { %v1358_v19 = vmul.f32 0.5, %v1355_v32  ;;  %v2561_v6 = vpop.eup %2560  ;;  %v1863_v32 = vrot.slane (!%p2301_p2), %v3324_v46, 4 }
 0x488   : > { %v1359_v20 = vmul.f32 0.5, %v1356_v36  ;;  %v1357_v29 = vadd.f32 1.0, %v2561_v6  ;;  %v1859_v36 = vld [vmem:[%s3505_s5 + $0xc] sm:$0x3] (!%p2301_p2) }
 0x489   : > { %v1363_v37 = vmul.f32 %v2559_v38, %v1358_v19  ;;  %v1940_v19 = vrot.slane (!%p2301_p2), %v3320_v44, 7 }
 0x48a   : > { %v1362_v21 = vmul.f32 %v1359_v20, %v1258_v5  ;;  %v1360_v41 = vmul.f32 0.5, %v1357_v29  ;;  %v1544_v5 = vsel (!%p2301_p2), %vm1385_vm0, %v1543_v60, %v1542_v59  ;;  %v1939_v20 = vld [vmem:[%s3505_s5 + $0xe] sm:$0x3] (!%p2301_p2) }
 0x48b   : > { %v1545_v8 = vsel (!%p2301_p2), %vm1388_vm1, %v3324_v46, %v1544_v5 }
 0x48c   : > { %v1364_v33 = vadd.f32 %v1363_v37, %v1362_v21  ;;  %v1862_v37 = vsel (!%p2301_p2), %vm1385_vm0, %v1861_v18, %v1860_v34  ;;  %v1941_v21 = vrot.slane (!%p2301_p2), %v3322_v45, 6 }
 0x48d   : > { %v1864_v6 = vsel (!%p2301_p2), %vm1388_vm1, %v1863_v32, %v1862_v37 }
 0x48e   : > { %2562 = vtanh.f32 %v1364_v33  ;;  %1369 = vst [vmem:[%s2980_s20] sm:$0xff] %v1364_v33  ;;  %v1943_v33 = vrot.slane (!%p2301_p2), %v3324_v46, 5 }
 0x495   : > { %1373 = sbr.rel (%p2301_p2) target bundleno = 1438 (0x59e), region = 64 }
 0x498   : > { %v2563_v50 = vpop.eup %2562 }
 0x499   : > { %v1366_v51 = vmul.f32 %v2563_v50, %v1360_v41  ;;  %v1942_v41 = vsel (!%p2301_p2), %vm1385_vm0, %v1941_v21, %v1940_v19 }
 0x49b   : > { %1367 = vst [vmem:[#allocation2 + $0x18] sm:$0xff] %v1366_v51  ;;  %1368 = vst [vmem:[%s2978_s27] sm:$0xff] %v1366_v51  ;;  %v1944_v51 = vsel (!%p2301_p2), %vm1388_vm1, %v1943_v33, %v1942_v41 }
 0x4a2   : > { %v3326_v47 = vld [vmem:[#allocation2 + $0x18] sm:$0xff] }
 0x4a3   : > { %v1390_v55 = vrot.slane %v3326_v47, 6  ;;  %v1468_v56 = vrot.slane %v3326_v47, 5  ;;  %v1546_v1 = vrot.slane %v3326_v47, 7  ;;  %v1705_v25 = vrot.slane %v3326_v47, 1 }
 0x4a4   : > { %v1626_v30 = vsel %vm1391_vm3, %v3326_v47, %v1625_v28  ;;  %v1785_v31 = vrot.slane %v3326_v47, 2  ;;  %v1865_v27 = vrot.slane %v3326_v47, 3  ;;  %v1945_v29 = vrot.slane %v3326_v47, 4 }
 0x4a5   : > { %v1392_v3 = vsel %vm1391_vm3, %v1390_v55, %v1389_v61  ;;  %v1469_v4 = vsel %vm1391_vm3, %v1468_v56, %v1467_v62  ;;  %v1547_v22 = vsel %vm1391_vm3, %v1546_v1, %v1545_v8  ;;  %v1706_v39 = vsel %vm1391_vm3, %v1705_v25, %v1704_v16 }
 0x4a6   : > { %2330 = vmatmul.mubr.f32.vlgmr.msra.gmra.mrb[0].mxu0 %v1392_v3  ;;  %2335 = vmatmul.mubr.f32.vlgmr.msra.gmra.mrb[0].mxu1 %v1469_v4  ;;  %v1786_v38 = vsel %vm1391_vm3, %v1785_v31, %v1784_v26  ;;  %v1866_v50 = vsel %vm1391_vm3, %v1865_v27, %v1864_v6  ;;  %v1946_v53 = vsel %vm1391_vm3, %v1945_v29, %v1944_v51  ;;  %v2302_v3 = vld [vmem:[%s3506_s6] ss:$0 sm:$0xff] }
 0x4a7   : > { %2338 = vmatpush3.xpose.msra.mxu0 %v1541_v63  ;;  %2343 = vmatpush3.xpose.msra.mxu1 %v1620_v0 }
 0x4a8   : > { %2339 = vmatprep.mubr.msk.f32.mxu0 %vm2736_vm2, %v2735_v43  ;;  %2347 = vmatprep.subr.mxu0 %v2735_v43 }
 0x4a9   : > { %2344 = vmatprep.mubr.msk.f32.mxu1 %vm2736_vm2, %v2735_v43  ;;  %2352 = vmatprep.subr.mxu1 %v2735_v43 }
 0x4aa   : > { %2340 = vmatmul.mubr.f32.vlgmr.msra.gmra.mrb[2].mxu0 %v1547_v22  ;;  %2345 = vmatmul.mubr.f32.vlgmr.msra.gmra.mrb[2].mxu1 %v1626_v30 }
 0x4ab   : > { %2348 = vmatpush3.xpose.msra.mxu0 %v1699_v35  ;;  %2353 = vmatpush3.xpose.msra.mxu1 %v1779_v12 }
 0x4ac   : > { %2349 = vmatprep.mubr.msk.f32.mxu0 %vm2736_vm2, %v2735_v43  ;;  %2357 = vmatprep.subr.mxu0 %v2735_v43 }
 0x4ad   : > { %2354 = vmatprep.mubr.msk.f32.mxu1 %vm2736_vm2, %v2735_v43  ;;  %2362 = vmatprep.subr.mxu1 %v2735_v43 }
 0x4ae   : > { %2350 = vmatmul.mubr.f32.vlgmr.msra.gmra.mrb[4].mxu0 %v1706_v39  ;;  %2355 = vmatmul.mubr.f32.vlgmr.msra.gmra.mrb[4].mxu1 %v1786_v38 }
 0x4af   : > { %2358 = vmatpush3.xpose.msra.mxu0 %v1859_v36  ;;  %2363 = vmatpush3.xpose.msra.mxu1 %v1939_v20 }
 0x4b0   : > { %2359 = vmatprep.mubr.msk.f32.mxu0 %vm2736_vm2, %v2735_v43  ;;  %2364 = vmatprep.mubr.msk.f32.mxu1 %vm2736_vm2, %v2735_v43 }
 0x4b2   : > { %2360 = vmatmul.mubr.f32.vlgmr.msra.gmra.mrb[6].mxu0 %v1866_v50  ;;  %2365 = vmatmul.mubr.f32.vlgmr.msra.gmra.mrb[6].mxu1 %v1946_v53 }
 0x579   : > { %v1460_v42 = vpop.f32.mrb[0].mxu0  ;;  %v1537_v44 = vpop.f32.mrb[0].mxu1 }
 0x57a   : > { %v1538_v45 = vadd.f32 %v1537_v44, %v1460_v42  ;;  %v2331_v46 = vpop.f32.mrb[1].mxu0  ;;  %v2336_v47 = vpop.f32.mrb[1].mxu1 }
 0x57d   : > { %v1615_v48 = vpop.f32.mrb[2].mxu0  ;;  %v1694_v49 = vpop.f32.mrb[2].mxu1 }
 0x57e   : > { %v1619_v52 = vadd.f32 %v1615_v48, %v1538_v45  ;;  %v2341_v54 = vpop.f32.mrb[3].mxu0  ;;  %v2346_v55 = vpop.f32.mrb[3].mxu1 }
 0x580   : > { %v1698_v56 = vadd.f32 %v1694_v49, %v1619_v52 }
 0x581   : > { %v1774_v57 = vpop.f32.mrb[4].mxu0  ;;  %v1854_v58 = vpop.f32.mrb[4].mxu1 }
 0x582   : > { %v1778_v59 = vadd.f32 %v1774_v57, %v1698_v56  ;;  %v2351_v60 = vpop.f32.mrb[5].mxu0  ;;  %v2356_v43 = vpop.f32.mrb[5].mxu1 }
 0x584   : > { %v1858_v61 = vadd.f32 %v1854_v58, %v1778_v59 }
 0x585   : > { %v1934_v62 = vpop.f32.mrb[6].mxu0  ;;  %v2014_v63 = vpop.f32.mrb[6].mxu1 }
 0x586   : > { %v1938_v0 = vadd.f32 %v1934_v62, %v1858_v61  ;;  %v2361_v1 = vpop.f32.mrb[7].mxu0  ;;  %v2366_v2 = vpop.f32.mrb[7].mxu1 }
 0x588   : > { %v2018_v4 = vadd.f32 %v2014_v63, %v1938_v0 }
 0x58a   : > { %v2026_v5 = vadd.f32 %v2302_v3, %v2018_v4 }
 0x58c   : > { %v2027_v7 = vmul.f32 0.5, %v2026_v5 }
 0x58e   : > { %2564 = vtanh.f32 %v2027_v7 }
 0x598   : > { %v2565_v8 = vpop.eup %2564 }
 0x599   : > { %v2029_v9 = vadd.f32 1.0, %v2565_v8 }
 0x59b   : > { %v2030_v10 = vmul.f32 0.5, %v2029_v9 }
 0x59d   : > { %2032 = vst.msk [vmem:[%s3507_s7] sm:$0xf] %vm2031_vm4, %v2030_v10 }
 0x59e PF: > { %s2305_s14 = sshll.u32 %s2810_s13, 7  ;;  %s2055_s28 = sshll.u32 %s2978_s27, 4  ;;  %s2056_s28 = int_to_ptr.vmem [resolvable:$true] %s2055_s28 }
 0x59f   : > { %s3436_s26 = scalar_lea.hbm %s3508_s8, %s2305_s14  ;;  %s2034_s11 = scalar_lea.sflag [#allocation5], %s2948_s29 }
 0x5a0   : > { %s2626_s23 = scalar_lea.vmem %s2056_s28, 128  ;;  %p3543_p4 = scmp.ne.s32.totalorder %s3527_s21, 0 }
 0x5a1   : > { %p2627_p9 = scmp.ne.s32.totalorder %s2056_s28, %s2626_s23  ;;  %s2737_s19 = smov [#allocation8]  }
 0x5a2   : > { %s2630_s2 = sshll.u32 %s2737_s19, 4  ;;  %s2631_s2 = int_to_ptr.vmem [resolvable:$false] %s2630_s2 }
 0x5a3   : > { %p2628_p5 = pnand %p2627_p9, %p3543_p4  ;;  %s2632_s16 = scalar_lea.vmem %s2631_s2, 256 }
 0x5a4   : > { %p2633_p11 = scmp.lt.s32.totalorder %s2056_s28, %s2631_s2  ;;  %p2634_p7 = scmp.lt.s32.totalorder %s2632_s16, %s2626_s23 }
 0x5a5   : > { %p2629_p10 = pneg %p2628_p5 }
 0x5a6   : > { %p2635_p8 = por %p2634_p7, %p2633_p11 }
 0x5a8   : > { %p2636_p13 = pnand %p2635_p8, %p2629_p10 }
 0x5aa   : > { %2639 = shalt.err (!%p2636_p13)
}
 0x5ab   : > { %s2640_s27 = scalar_lea.hbm %s3436_s26, 128  ;;  %s2644_s17 = scalar_lea.hbm %s3508_s8, 384 }
 0x5ac   : > { %p2641_p1 = scmp.ne.s32.totalorder %s3436_s26, %s2640_s27  ;;  %p2645_p12 = scmp.lt.u32.totalorder %s3436_s26, %s3508_s8 }
 0x5ad   : > { %p2646_p0 = scmp.lt.u32.totalorder %s2644_s17, %s2640_s27  ;;  %p2648_p9 = scmp.lt.u32.totalorder %s2640_s27, %s3436_s26 }
 0x5ae   : > { %p2642_p3 = pnand %p2641_p1, %p3543_p4 }
 0x5af   : > { %p2647_p2 = por %p2646_p0, %p2645_p12 }
 0x5b0   : > { %p2643_p6 = pneg %p2642_p3 }
 0x5b1   : > { %p2649_p5 = por %p2648_p9, %p2647_p2 }
 0x5b3   : > { %p2650_p10 = pnand %p2649_p5, %p2643_p6 }
 0x5b5   : > { %2653 = shalt.err (!%p2650_p10)
}
 0x5b6   : > { %2371 = dma.vmem_to_hbm [thread:$0]  (%p3543_p4), %s2056_s28, 128, %s3436_s26, %s2034_s11  }
 0x5b7   : > { %s3462_s19 = scalar_lea.hbm %s3509_s9, %s2305_s14  ;;  %s2068_s2 = sshll.u32 %s2980_s20, 4  ;;  %s2069_s2 = int_to_ptr.vmem [resolvable:$true] %s2068_s2 }
 0x5b8   : > { %s2039_s16 = scalar_lea.sflag [#allocation10], %s2948_s29  ;;  %s2654_s27 = scalar_lea.vmem %s2069_s2, 128 }
 0x5b9   : > { %p2655_p11 = scmp.ne.s32.totalorder %s2069_s2, %s2654_s27  ;;  %s2738_s15 = smov [#allocation9]  }
 0x5ba   : > { %s2658_s18 = sshll.u32 %s2738_s15, 4  ;;  %s2659_s18 = int_to_ptr.vmem [resolvable:$false] %s2658_s18 }
 0x5bb   : > { %p2656_p7 = pnand %p2655_p11, %p3543_p4  ;;  %s2660_s17 = scalar_lea.vmem %s2659_s18, 256 }
 0x5bc   : > { %p2661_p13 = scmp.lt.s32.totalorder %s2069_s2, %s2659_s18  ;;  %p2662_p1 = scmp.lt.s32.totalorder %s2660_s17, %s2654_s27 }
 0x5bd   : > { %p2657_p8 = pneg %p2656_p7 }
 0x5be   : > { %p2663_p3 = por %p2662_p1, %p2661_p13 }
 0x5c0   : > { %p2664_p6 = pnand %p2663_p3, %p2657_p8 }
 0x5c2   : > { %2667 = shalt.err (!%p2664_p6)
}
 0x5c3   : > { %s2668_s13 = scalar_lea.hbm %s3462_s19, 128  ;;  %s2672_s14 = scalar_lea.hbm %s3509_s9, 384 }
 0x5c4   : > { %p2669_p12 = scmp.ne.s32.totalorder %s3462_s19, %s2668_s13  ;;  %p2673_p9 = scmp.lt.u32.totalorder %s3462_s19, %s3509_s9 }
 0x5c5   : > { %p2674_p5 = scmp.lt.u32.totalorder %s2672_s14, %s2668_s13  ;;  %p2676_p11 = scmp.lt.u32.totalorder %s2668_s13, %s3462_s19 }
 0x5c6   : > { %p2670_p0 = pnand %p2669_p12, %p3543_p4 }
 0x5c7   : > { %p2675_p10 = por %p2674_p5, %p2673_p9 }
 0x5c8   : > { %p2671_p2 = pneg %p2670_p0 }
 0x5c9   : > { %p2677_p7 = por %p2676_p11, %p2675_p10 }
 0x5cb   : > { %p2678_p8 = pnand %p2677_p7, %p2671_p2 }
 0x5cd   : > { %2681 = shalt.err (!%p2678_p8)
}
 0x5ce   : > { %2372 = dma.vmem_to_hbm [thread:$0]  (%p3543_p4), %s2069_s2, 128, %s3462_s19, %s2039_s16  }
 0x5cf PF: > { %p2390_p13 = scmp.ge.s32.totalorder %s2728_s12, 2  ;;  %s2083_s11 = sand.u32 1, %s2716_s30  }
 0x5d0   : > { %p3544_p1 = scmp.ne.s32.totalorder %s3528_s22, 0  ;;  %s2084_s25 = scalar_lea.sflag [#allocation5], %s2083_s11 }
 0x5d2   : > { %p2383_p3 = pnand %p2390_p13, %p3544_p1 }
 0x5d4   : > { %2707 = dma.done.wait (!%p2383_p3), %s2084_s25, 128  }
 0x5d5   : > { %2709 = vsyncadd (!%p2383_p3), %s2084_s25, 4294967168  ;;  %s2093_s24 = scalar_lea.sflag [#allocation10], %s2083_s11 }
 0x5d6   : > { %2711 = dma.done.wait (!%p2383_p3), %s2093_s24, 128  }
 0x5d7   : > { %2713 = vsyncadd (!%p2383_p3), %s2093_s24, 4294967168  ;;  %s3545_s12 = sld [smem:[#allocation16_spill]]  ;;  %s3546_s1 = sld [smem:[#allocation15_spill]] }
 0x5d8   : > { %s3547_s11 = sld [smem:[#allocation17_spill]]  ;;  %s3548_s30 = smov %s2720_s10 }
 0x5dd   : > { %p29_p4 = scmp.ge.s32.totalorder %s3545_s12, 5   ;;  %s3549_s10 = smov %s3546_s1 }
 0x5df   :  { %31 = sbr.rel (!%p29_p4) target bundleno = 12 (0xc), region = 145 }
 0x5e6   :  { %2098 = vsyncpa [#allocation4], 1 }
 0x5e7   :  { %2100 = vsyncpa [#allocation4 + $0x1], 1 }
 0x5e8   :  { %2101 = vsyncpa [#allocation7], 1 }
 0x5e9   :  { %2103 = vsyncpa [#allocation7 + $0x1], 1 }
 0x5ea   :  { %2104 = vsyncpa [#allocation5], 1 }
 0x5eb   :  { %2106 = vsyncpa [#allocation5 + $0x1], 1 }
 0x5ec   :  { %2107 = vsyncpa [#allocation10], 1 }
 0x5ed   :  { %2109 = vsyncpa [#allocation10 + $0x1], 1 }

</bundles_post_ra>
